<compile_context>
chip_gen: v7x
topology: tpu7x:2x2x1
jax: 0.10.0
libtpu: 0.0.40
codegen_flags: <defaults>
</compile_context>

<pallas_src>
import functools
import math

import jax
import jax.numpy as jnp
from jax.experimental import pallas as pl
from jax.experimental.pallas import tpu as pltpu

# Current name is pltpu.CompilerParams; keep a one-line legacy fallback.
_CompilerParams = getattr(pltpu, "CompilerParams", None)
if _CompilerParams is None:  # pragma: no cover
    _CompilerParams = pltpu.TPUCompilerParams


def _vmem_limit_bytes():
    """Raise the scoped-VMEM limit toward physical capacity, per generation."""
    try:
        cap = pltpu.get_tpu_info().vmem_capacity_bytes  # 128 MiB v5e/v6e, 64 MiB v7x
    except Exception:
        cap = 64 * 1024 * 1024
    return int(cap * 3 // 4)


# -----------------------------------------------------------------------------
# Fused kernel: one grid step == one batch element.
#   q_ref: (Lq, D) f32      k_ref/v_ref: (Lk, D) f32
#   w*_ref: (D, D) bf16 (pre-cast)      b*_ref: (1, D) f32
#   ctx_ref: (Lq, D) f32 block of the (B*Lq, D) output (lane dense)
#   attn_ref: (H, Lq*Lk) block (flatten_attn) or (H, 1, Lq, Lk) block
# -----------------------------------------------------------------------------
def _mha_fused_kernel(q_ref, k_ref, v_ref,
                      wq_ref, bq_ref, wk_ref, bk_ref, wv_ref, bv_ref,
                      ctx_ref, attn_ref,
                      *, num_heads, scale, flatten_attn):
    Lq, D = q_ref.shape
    Lk = k_ref.shape[0]
    dh = D // num_heads

    def proj(x_ref, w_ref, b_ref):
        # bf16 MXU inputs, f32 accumulation, f32 bias add; keep result bf16.
        y = jnp.dot(x_ref[...].astype(jnp.bfloat16), w_ref[...],
                    preferred_element_type=jnp.float32) + b_ref[...]
        return y.astype(jnp.bfloat16)

    q = proj(q_ref, wq_ref, bq_ref)   # (Lq, D) bf16, heads along lanes
    k = proj(k_ref, wk_ref, bk_ref)   # (Lk, D) bf16
    v = proj(v_ref, wv_ref, bv_ref)   # (Lk, D) bf16

    ctx_parts = []
    attn_rows = []
    for h in range(num_heads):
        lo = h * dh
        q_h = q[:, lo:lo + dh]        # (Lq, dh)  lane-slice head split
        k_h = k[:, lo:lo + dh]        # (Lk, dh)
        v_h = v[:, lo:lo + dh]        # (Lk, dh)

        # scores = Q_h @ K_h^T / sqrt(d_model)   (contract last dims, no .T)
        s = jax.lax.dot_general(
            q_h, k_h, dimension_numbers=(((1,), (1,)), ((), ())),
            preferred_element_type=jnp.float32) * scale          # (Lq, Lk) f32

        # Numerically-stable softmax in f32; divide -> EUP reciprocal + mul.
        s = s - jnp.max(s, axis=-1, keepdims=True)
        p = jnp.exp(s)
        denom = jnp.sum(p, axis=-1, keepdims=True)
        attn_h = p * pl.reciprocal(denom, approx=True)            # (Lq, Lk) f32

        # context_h = P @ V_h  (bf16 MXU inputs, f32 accumulation)
        ctx_h = jnp.dot(attn_h.astype(jnp.bfloat16), v_h,
                        preferred_element_type=jnp.float32)       # (Lq, dh)
        ctx_parts.append(ctx_h)

        if flatten_attn:
            # Flatten (Lq, Lk) -> (1, Lq*Lk) with lane concats of row slices so
            # the attn store is lane-dense even though Lk < 128.
            attn_rows.append(jnp.concatenate(
                [attn_h[r:r + 1, :] for r in range(Lq)], axis=1))
        else:
            # Lk is a multiple of 128 (production path): direct store is dense.
            attn_ref[h, 0, :, :] = attn_h.astype(attn_ref.dtype)

    # One full-width, lane-dense store of the head-concatenated context block.
    ctx_ref[...] = jnp.concatenate(ctx_parts, axis=-1).astype(ctx_ref.dtype)
    if flatten_attn:
        attn_ref[...] = jnp.concatenate(attn_rows, axis=0).astype(attn_ref.dtype)


# -----------------------------------------------------------------------------
# Wrapper: full MultiHeadAttention forward in a single pallas_call.
# -----------------------------------------------------------------------------
def multi_head_attention(params, query, key, value, *, num_heads,
                         attn_dtype=jnp.float32):
    """query: (B, Lq, D); key/value: (B, Lk, D) f32 -> (context, attn)."""
    wq, bq, wk, bk, wv, bv = params
    B, Lq, D = query.shape
    Lk = key.shape[1]
    Lv = value.shape[1]
    assert D % num_heads == 0
    assert Lk == Lv

    # Pre-cast weights to bf16 once (reused across calls); biases stay f32.
    wq_b, wk_b, wv_b = (w.astype(jnp.bfloat16) for w in (wq, wk, wv))

    q2d = query.reshape(B * Lq, D)
    k2d = key.reshape(B * Lk, D)
    v2d = value.reshape(B * Lv, D)

    # Lane-dense attn layout for small Lk: rows = heads, columns = flattened
    # (q, k) pairs of one batch element.  Production path (Lk % 128 == 0) is
    # already lane-dense in the plain (H, B, Lq, Lk) layout.
    flatten_attn = (Lk % 128 != 0) and ((Lq * Lk) % 128 == 0 or B == 1) and Lq <= 64

    if flatten_attn:
        attn_shape = jax.ShapeDtypeStruct((num_heads, B * Lq * Lk), attn_dtype)
        attn_spec = pl.BlockSpec((num_heads, Lq * Lk), lambda b: (0, b))
    else:
        attn_shape = jax.ShapeDtypeStruct((num_heads, B, Lq, Lk), attn_dtype)
        attn_spec = pl.BlockSpec((num_heads, 1, Lq, Lk), lambda b: (0, b, 0, 0))

    kernel = functools.partial(_mha_fused_kernel, num_heads=num_heads,
                               scale=1.0 / math.sqrt(D),   # reference: sqrt(d_model)
                               flatten_attn=flatten_attn)

    ctx2d, attn_raw = pl.pallas_call(
        kernel,
        grid=(B,),
        in_specs=[
            pl.BlockSpec((Lq, D), lambda b: (b, 0)),   # query rows of batch b
            pl.BlockSpec((Lk, D), lambda b: (b, 0)),   # key rows
            pl.BlockSpec((Lk, D), lambda b: (b, 0)),   # value rows
            pl.BlockSpec((D, D), lambda b: (0, 0)),    # Wq (stays resident)
            pl.BlockSpec((1, D), lambda b: (0, 0)),    # bq
            pl.BlockSpec((D, D), lambda b: (0, 0)),    # Wk
            pl.BlockSpec((1, D), lambda b: (0, 0)),    # bk
            pl.BlockSpec((D, D), lambda b: (0, 0)),    # Wv
            pl.BlockSpec((1, D), lambda b: (0, 0)),    # bv
        ],
        out_specs=(
            pl.BlockSpec((Lq, D), lambda b: (b, 0)),   # context rows (lane dense)
            attn_spec,
        ),
        out_shape=(
            jax.ShapeDtypeStruct((B * Lq, D), jnp.float32),
            attn_shape,
        ),
        compiler_params=_CompilerParams(
            dimension_semantics=("parallel",),          # megacore sharding on v7x
            vmem_limit_bytes=_vmem_limit_bytes(),
        ),
    )(q2d, k2d, v2d, wq_b, bq, wk_b, bk, wv_b, bv)

    # Free, row-major-compatible reshapes only (no transposes / copies).
    context = ctx2d.reshape(B, Lq, D)
    if flatten_attn:
        attn = attn_raw.reshape(num_heads, B, Lq, Lk)
    else:
        attn = attn_raw
    attn = attn.reshape(num_heads * B, Lq, Lk)
    return context, attn


# -----------------------------------------------------------------------------
# Pure-JAX f32 reference (for a sanity check) and parameter init.
# -----------------------------------------------------------------------------
def mha_reference(params, query, key, value, num_heads):
    wq, bq, wk, bk, wv, bv = params
    B, Lq, D = query.shape
    Lk = key.shape[1]
    dh = D // num_heads

    def split(x, w, b, L):
        y = x.reshape(B * L, D) @ w + b
        return (y.reshape(B, L, num_heads, dh)
                 .transpose(2, 0, 1, 3)
                 .reshape(num_heads * B, L, dh))

    q = split(query, wq, bq, Lq)
    k = split(key, wk, bk, Lk)
    v = split(value, wv, bv, Lk)
    s = jnp.einsum('gld,gtd->glt', q, k) / math.sqrt(D)
    a = jax.nn.softmax(s, axis=-1)
    c = jnp.einsum('glt,gtd->gld', a, v)
    ctx = (c.reshape(num_heads, B, Lq, dh)
            .transpose(1, 2, 0, 3)
            .reshape(B, Lq, D))
    return ctx, a


def init_params(rng, d_model):
    ks = jax.random.split(rng, 6)
    w = lambda k: jax.random.normal(k, (d_model, d_model), jnp.float32) * 0.05
    b = lambda k: jax.random.normal(k, (1, d_model), jnp.float32) * 0.05
    # Weights stored (in_features, out_features): y = x @ W + b (== x @ W_pt.T + b).
    return (w(ks[0]), b(ks[1]), w(ks[2]), b(ks[3]), w(ks[4]), b(ks[5]))


if __name__ == "__main__":
    B, LQ, LK = 2, 8, 16
    D_MODEL, NUM_HEADS = 128, 8          # d_head = 16

    root = jax.random.PRNGKey(0)
    kq, kk, kv, kp = jax.random.split(root, 4)
    query = jax.random.normal(kq, (B, LQ, D_MODEL), jnp.float32)
    key_t = jax.random.normal(kk, (B, LK, D_MODEL), jnp.float32)
    value = jax.random.normal(kv, (B, LK, D_MODEL), jnp.float32)
    params = init_params(kp, D_MODEL)

    fn = jax.jit(functools.partial(multi_head_attention, num_heads=NUM_HEADS))
    context, attn = fn(params, query, key_t, value)
    jax.block_until_ready((context, attn))

    assert context.shape == (B, LQ, D_MODEL), context.shape
    assert attn.shape == (B * NUM_HEADS, LQ, LK), attn.shape

    # Sanity check against an f32 pure-JAX reference (loose tol: bf16 MXU inputs
    # and approx EUP reciprocal in the softmax).
    ctx_expected, attn_expected = mha_reference(params, query, key_t, value, NUM_HEADS)
    assert jnp.allclose(context, ctx_expected, atol=3e-2, rtol=3e-2), float(
        jnp.max(jnp.abs(context - ctx_expected)))
    assert jnp.allclose(attn, attn_expected, atol=3e-2, rtol=3e-2), float(
        jnp.max(jnp.abs(attn - attn_expected)))

    print("KERNEL_OK")
</pallas_src>

<mosaic_0001>
module attributes {stable_mosaic.version = 11 : i64} {
  func.func @_mha_fused_kernel(%arg0: i32, %arg1: memref<8x128xf32, #tpu.memory_space<vmem>>, %arg2: memref<16x128xf32, #tpu.memory_space<vmem>>, %arg3: memref<16x128xf32, #tpu.memory_space<vmem>>, %arg4: memref<128x128xbf16, #tpu.memory_space<vmem>>, %arg5: memref<1x128xf32, #tpu.memory_space<vmem>>, %arg6: memref<128x128xbf16, #tpu.memory_space<vmem>>, %arg7: memref<1x128xf32, #tpu.memory_space<vmem>>, %arg8: memref<128x128xbf16, #tpu.memory_space<vmem>>, %arg9: memref<1x128xf32, #tpu.memory_space<vmem>>, %arg10: memref<8x128xf32, #tpu.memory_space<vmem>>, %arg11: memref<8x128xf32, #tpu.memory_space<vmem>>) attributes {dimension_semantics = [#tpu.dimension_semantics<parallel>], iteration_bounds = array<i64: 2>, scalar_prefetch = 0 : i64, scratch_operands = 0 : i64, tpu.core_type = #tpu.core_type<tc>, window_params = [{transform_indices = @transform_0, window_bounds = array<i64: 8, 128>}, {transform_indices = @transform_1, window_bounds = array<i64: 16, 128>}, {transform_indices = @transform_2, window_bounds = array<i64: 16, 128>}, {pipeline_mode = #tpu.pipeline_mode<synchronous>, transform_indices = @transform_3, window_bounds = array<i64: 128, 128>}, {pipeline_mode = #tpu.pipeline_mode<synchronous>, transform_indices = @transform_4, window_bounds = array<i64: 1, 128>}, {pipeline_mode = #tpu.pipeline_mode<synchronous>, transform_indices = @transform_5, window_bounds = array<i64: 128, 128>}, {pipeline_mode = #tpu.pipeline_mode<synchronous>, transform_indices = @transform_6, window_bounds = array<i64: 1, 128>}, {pipeline_mode = #tpu.pipeline_mode<synchronous>, transform_indices = @transform_7, window_bounds = array<i64: 128, 128>}, {pipeline_mode = #tpu.pipeline_mode<synchronous>, transform_indices = @transform_8, window_bounds = array<i64: 1, 128>}, {transform_indices = @transform_9, window_bounds = array<i64: 8, 128>}, {transform_indices = @transform_10, window_bounds = array<i64: 8, 128>}]} {
    %c0 = arith.constant 0 : index
    %c0_0 = arith.constant 0 : index
    %0 = vector.load %arg1[%c0, %c0_0] : memref<8x128xf32, #tpu.memory_space<vmem>>, vector<8x128xf32>
    %1 = arith.truncf %0 : vector<8x128xf32> to vector<8x128xbf16>
    %c0_1 = arith.constant 0 : index
    %c0_2 = arith.constant 0 : index
    %2 = vector.load %arg4[%c0_1, %c0_2] : memref<128x128xbf16, #tpu.memory_space<vmem>>, vector<128x128xbf16>
    %cst = arith.constant dense<0.000000e+00> : vector<8x128xf32>
    %3 = tpu.matmul %1, %2, %cst {dimension_numbers = #tpu.dot_dimension_numbers<[1], [0], [0], [1], [0, 0, 1, 1], [], []>} : vector<8x128xbf16>, vector<128x128xbf16>, vector<8x128xf32> -> vector<8x128xf32>
    %c0_3 = arith.constant 0 : index
    %c0_4 = arith.constant 0 : index
    %4 = vector.load %arg5[%c0_3, %c0_4] : memref<1x128xf32, #tpu.memory_space<vmem>>, vector<1x128xf32>
    %5 = vector.broadcast %4 : vector<1x128xf32> to vector<8x128xf32>
    %6 = arith.addf %3, %5 : vector<8x128xf32>
    %7 = arith.truncf %6 : vector<8x128xf32> to vector<8x128xbf16>
    %c0_5 = arith.constant 0 : index
    %c0_6 = arith.constant 0 : index
    %8 = vector.load %arg2[%c0_5, %c0_6] : memref<16x128xf32, #tpu.memory_space<vmem>>, vector<16x128xf32>
    %9 = arith.truncf %8 : vector<16x128xf32> to vector<16x128xbf16>
    %c0_7 = arith.constant 0 : index
    %c0_8 = arith.constant 0 : index
    %10 = vector.load %arg6[%c0_7, %c0_8] : memref<128x128xbf16, #tpu.memory_space<vmem>>, vector<128x128xbf16>
    %cst_9 = arith.constant dense<0.000000e+00> : vector<16x128xf32>
    %11 = tpu.matmul %9, %10, %cst_9 {dimension_numbers = #tpu.dot_dimension_numbers<[1], [0], [0], [1], [0, 0, 1, 1], [], []>} : vector<16x128xbf16>, vector<128x128xbf16>, vector<16x128xf32> -> vector<16x128xf32>
    %c0_10 = arith.constant 0 : index
    %c0_11 = arith.constant 0 : index
    %12 = vector.load %arg7[%c0_10, %c0_11] : memref<1x128xf32, #tpu.memory_space<vmem>>, vector<1x128xf32>
    %13 = vector.broadcast %12 : vector<1x128xf32> to vector<16x128xf32>
    %14 = arith.addf %11, %13 : vector<16x128xf32>
    %15 = arith.truncf %14 : vector<16x128xf32> to vector<16x128xbf16>
    %c0_12 = arith.constant 0 : index
    %c0_13 = arith.constant 0 : index
    %16 = vector.load %arg3[%c0_12, %c0_13] : memref<16x128xf32, #tpu.memory_space<vmem>>, vector<16x128xf32>
    %17 = arith.truncf %16 : vector<16x128xf32> to vector<16x128xbf16>
    %c0_14 = arith.constant 0 : index
    %c0_15 = arith.constant 0 : index
    %18 = vector.load %arg8[%c0_14, %c0_15] : memref<128x128xbf16, #tpu.memory_space<vmem>>, vector<128x128xbf16>
    %cst_16 = arith.constant dense<0.000000e+00> : vector<16x128xf32>
    %19 = tpu.matmul %17, %18, %cst_16 {dimension_numbers = #tpu.dot_dimension_numbers<[1], [0], [0], [1], [0, 0, 1, 1], [], []>} : vector<16x128xbf16>, vector<128x128xbf16>, vector<16x128xf32> -> vector<16x128xf32>
    %c0_17 = arith.constant 0 : index
    %c0_18 = arith.constant 0 : index
    %20 = vector.load %arg9[%c0_17, %c0_18] : memref<1x128xf32, #tpu.memory_space<vmem>>, vector<1x128xf32>
    %21 = vector.broadcast %20 : vector<1x128xf32> to vector<16x128xf32>
    %22 = arith.addf %19, %21 : vector<16x128xf32>
    %23 = arith.truncf %22 : vector<16x128xf32> to vector<16x128xbf16>
    %24 = vector.extract_strided_slice %7 {offsets = [0, 0], sizes = [8, 16], strides = [1, 1]} : vector<8x128xbf16> to vector<8x16xbf16>
    %25 = vector.extract_strided_slice %15 {offsets = [0, 0], sizes = [16, 16], strides = [1, 1]} : vector<16x128xbf16> to vector<16x16xbf16>
    %26 = vector.extract_strided_slice %23 {offsets = [0, 0], sizes = [16, 16], strides = [1, 1]} : vector<16x128xbf16> to vector<16x16xbf16>
    %cst_19 = arith.constant dense<0.000000e+00> : vector<8x16xf32>
    %27 = tpu.matmul %24, %25, %cst_19 {dimension_numbers = #tpu.dot_dimension_numbers<[1], [1], [0], [0], [0, 0, 1, 0], [], []>} : vector<8x16xbf16>, vector<16x16xbf16>, vector<8x16xf32> -> vector<8x16xf32>
    %cst_20 = arith.constant 0.0883883461 : f32
    %28 = vector.broadcast %cst_20 : f32 to vector<8x16xf32>
    %29 = arith.mulf %27, %28 : vector<8x16xf32>
    %cst_21 = arith.constant dense<0xFF800000> : vector<8xf32>
    %30 = vector.multi_reduction <maximumf>, %29, %cst_21 [1] : vector<8x16xf32> to vector<8xf32>
    %31 = vector.shape_cast %30 : vector<8xf32> to vector<8x1xf32>
    %32 = vector.broadcast %31 : vector<8x1xf32> to vector<8x16xf32>
    %33 = arith.subf %29, %32 : vector<8x16xf32>
    %34 = math.exp %33 : vector<8x16xf32>
    %cst_22 = arith.constant dense<0.000000e+00> : vector<8xf32>
    %35 = vector.multi_reduction <add>, %34, %cst_22 [1] : vector<8x16xf32> to vector<8xf32>
    %36 = vector.shape_cast %35 : vector<8xf32> to vector<8x1xf32>
    %37 = tpu.reciprocal %36 {approx = true} : vector<8x1xf32> -> vector<8x1xf32>
    %38 = vector.broadcast %37 : vector<8x1xf32> to vector<8x16xf32>
    %39 = arith.mulf %34, %38 : vector<8x16xf32>
    %40 = arith.truncf %39 : vector<8x16xf32> to vector<8x16xbf16>
    %cst_23 = arith.constant dense<0.000000e+00> : vector<8x16xf32>
    %41 = tpu.matmul %40, %26, %cst_23 {dimension_numbers = #tpu.dot_dimension_numbers<[1], [0], [0], [1], [0, 0, 1, 1], [], []>} : vector<8x16xbf16>, vector<16x16xbf16>, vector<8x16xf32> -> vector<8x16xf32>
    %42 = vector.extract_strided_slice %39 {offsets = [0, 0], sizes = [1, 16], strides = [1, 1]} : vector<8x16xf32> to vector<1x16xf32>
    %43 = vector.extract_strided_slice %39 {offsets = [1, 0], sizes = [1, 16], strides = [1, 1]} : vector<8x16xf32> to vector<1x16xf32>
    %44 = vector.extract_strided_slice %39 {offsets = [2, 0], sizes = [1, 16], strides = [1, 1]} : vector<8x16xf32> to vector<1x16xf32>
    %45 = vector.extract_strided_slice %39 {offsets = [3, 0], sizes = [1, 16], strides = [1, 1]} : vector<8x16xf32> to vector<1x16xf32>
    %46 = vector.extract_strided_slice %39 {offsets = [4, 0], sizes = [1, 16], strides = [1, 1]} : vector<8x16xf32> to vector<1x16xf32>
    %47 = vector.extract_strided_slice %39 {offsets = [5, 0], sizes = [1, 16], strides = [1, 1]} : vector<8x16xf32> to vector<1x16xf32>
    %48 = vector.extract_strided_slice %39 {offsets = [6, 0], sizes = [1, 16], strides = [1, 1]} : vector<8x16xf32> to vector<1x16xf32>
    %49 = vector.extract_strided_slice %39 {offsets = [7, 0], sizes = [1, 16], strides = [1, 1]} : vector<8x16xf32> to vector<1x16xf32>
    %50 = tpu.concatenate %42, %43, %44, %45, %46, %47, %48, %49 in 1 : vector<1x16xf32>, vector<1x16xf32>, vector<1x16xf32>, vector<1x16xf32>, vector<1x16xf32>, vector<1x16xf32>, vector<1x16xf32>, vector<1x16xf32> -> vector<1x128xf32>
    %51 = vector.extract_strided_slice %7 {offsets = [0, 16], sizes = [8, 16], strides = [1, 1]} : vector<8x128xbf16> to vector<8x16xbf16>
    %52 = vector.extract_strided_slice %15 {offsets = [0, 16], sizes = [16, 16], strides = [1, 1]} : vector<16x128xbf16> to vector<16x16xbf16>
    %53 = vector.extract_strided_slice %23 {offsets = [0, 16], sizes = [16, 16], strides = [1, 1]} : vector<16x128xbf16> to vector<16x16xbf16>
    %cst_24 = arith.constant dense<0.000000e+00> : vector<8x16xf32>
    %54 = tpu.matmul %51, %52, %cst_24 {dimension_numbers = #tpu.dot_dimension_numbers<[1], [1], [0], [0], [0, 0, 1, 0], [], []>} : vector<8x16xbf16>, vector<16x16xbf16>, vector<8x16xf32> -> vector<8x16xf32>
    %cst_25 = arith.constant 0.0883883461 : f32
    %55 = vector.broadcast %cst_25 : f32 to vector<8x16xf32>
    %56 = arith.mulf %54, %55 : vector<8x16xf32>
    %cst_26 = arith.constant dense<0xFF800000> : vector<8xf32>
    %57 = vector.multi_reduction <maximumf>, %56, %cst_26 [1] : vector<8x16xf32> to vector<8xf32>
    %58 = vector.shape_cast %57 : vector<8xf32> to vector<8x1xf32>
    %59 = vector.broadcast %58 : vector<8x1xf32> to vector<8x16xf32>
    %60 = arith.subf %56, %59 : vector<8x16xf32>
    %61 = math.exp %60 : vector<8x16xf32>
    %cst_27 = arith.constant dense<0.000000e+00> : vector<8xf32>
    %62 = vector.multi_reduction <add>, %61, %cst_27 [1] : vector<8x16xf32> to vector<8xf32>
    %63 = vector.shape_cast %62 : vector<8xf32> to vector<8x1xf32>
    %64 = tpu.reciprocal %63 {approx = true} : vector<8x1xf32> -> vector<8x1xf32>
    %65 = vector.broadcast %64 : vector<8x1xf32> to vector<8x16xf32>
    %66 = arith.mulf %61, %65 : vector<8x16xf32>
    %67 = arith.truncf %66 : vector<8x16xf32> to vector<8x16xbf16>
    %cst_28 = arith.constant dense<0.000000e+00> : vector<8x16xf32>
    %68 = tpu.matmul %67, %53, %cst_28 {dimension_numbers = #tpu.dot_dimension_numbers<[1], [0], [0], [1], [0, 0, 1, 1], [], []>} : vector<8x16xbf16>, vector<16x16xbf16>, vector<8x16xf32> -> vector<8x16xf32>
    %69 = vector.extract_strided_slice %66 {offsets = [0, 0], sizes = [1, 16], strides = [1, 1]} : vector<8x16xf32> to vector<1x16xf32>
    %70 = vector.extract_strided_slice %66 {offsets = [1, 0], sizes = [1, 16], strides = [1, 1]} : vector<8x16xf32> to vector<1x16xf32>
    %71 = vector.extract_strided_slice %66 {offsets = [2, 0], sizes = [1, 16], strides = [1, 1]} : vector<8x16xf32> to vector<1x16xf32>
    %72 = vector.extract_strided_slice %66 {offsets = [3, 0], sizes = [1, 16], strides = [1, 1]} : vector<8x16xf32> to vector<1x16xf32>
    %73 = vector.extract_strided_slice %66 {offsets = [4, 0], sizes = [1, 16], strides = [1, 1]} : vector<8x16xf32> to vector<1x16xf32>
    %74 = vector.extract_strided_slice %66 {offsets = [5, 0], sizes = [1, 16], strides = [1, 1]} : vector<8x16xf32> to vector<1x16xf32>
    %75 = vector.extract_strided_slice %66 {offsets = [6, 0], sizes = [1, 16], strides = [1, 1]} : vector<8x16xf32> to vector<1x16xf32>
    %76 = vector.extract_strided_slice %66 {offsets = [7, 0], sizes = [1, 16], strides = [1, 1]} : vector<8x16xf32> to vector<1x16xf32>
    %77 = tpu.concatenate %69, %70, %71, %72, %73, %74, %75, %76 in 1 : vector<1x16xf32>, vector<1x16xf32>, vector<1x16xf32>, vector<1x16xf32>, vector<1x16xf32>, vector<1x16xf32>, vector<1x16xf32>, vector<1x16xf32> -> vector<1x128xf32>
    %78 = vector.extract_strided_slice %7 {offsets = [0, 32], sizes = [8, 16], strides = [1, 1]} : vector<8x128xbf16> to vector<8x16xbf16>
    %79 = vector.extract_strided_slice %15 {offsets = [0, 32], sizes = [16, 16], strides = [1, 1]} : vector<16x128xbf16> to vector<16x16xbf16>
    %80 = vector.extract_strided_slice %23 {offsets = [0, 32], sizes = [16, 16], strides = [1, 1]} : vector<16x128xbf16> to vector<16x16xbf16>
    %cst_29 = arith.constant dense<0.000000e+00> : vector<8x16xf32>
    %81 = tpu.matmul %78, %79, %cst_29 {dimension_numbers = #tpu.dot_dimension_numbers<[1], [1], [0], [0], [0, 0, 1, 0], [], []>} : vector<8x16xbf16>, vector<16x16xbf16>, vector<8x16xf32> -> vector<8x16xf32>
    %cst_30 = arith.constant 0.0883883461 : f32
    %82 = vector.broadcast %cst_30 : f32 to vector<8x16xf32>
    %83 = arith.mulf %81, %82 : vector<8x16xf32>
    %cst_31 = arith.constant dense<0xFF800000> : vector<8xf32>
    %84 = vector.multi_reduction <maximumf>, %83, %cst_31 [1] : vector<8x16xf32> to vector<8xf32>
    %85 = vector.shape_cast %84 : vector<8xf32> to vector<8x1xf32>
    %86 = vector.broadcast %85 : vector<8x1xf32> to vector<8x16xf32>
    %87 = arith.subf %83, %86 : vector<8x16xf32>
    %88 = math.exp %87 : vector<8x16xf32>
    %cst_32 = arith.constant dense<0.000000e+00> : vector<8xf32>
    %89 = vector.multi_reduction <add>, %88, %cst_32 [1] : vector<8x16xf32> to vector<8xf32>
    %90 = vector.shape_cast %89 : vector<8xf32> to vector<8x1xf32>
    %91 = tpu.reciprocal %90 {approx = true} : vector<8x1xf32> -> vector<8x1xf32>
    %92 = vector.broadcast %91 : vector<8x1xf32> to vector<8x16xf32>
    %93 = arith.mulf %88, %92 : vector<8x16xf32>
    %94 = arith.truncf %93 : vector<8x16xf32> to vector<8x16xbf16>
    %cst_33 = arith.constant dense<0.000000e+00> : vector<8x16xf32>
    %95 = tpu.matmul %94, %80, %cst_33 {dimension_numbers = #tpu.dot_dimension_numbers<[1], [0], [0], [1], [0, 0, 1, 1], [], []>} : vector<8x16xbf16>, vector<16x16xbf16>, vector<8x16xf32> -> vector<8x16xf32>
    %96 = vector.extract_strided_slice %93 {offsets = [0, 0], sizes = [1, 16], strides = [1, 1]} : vector<8x16xf32> to vector<1x16xf32>
    %97 = vector.extract_strided_slice %93 {offsets = [1, 0], sizes = [1, 16], strides = [1, 1]} : vector<8x16xf32> to vector<1x16xf32>
    %98 = vector.extract_strided_slice %93 {offsets = [2, 0], sizes = [1, 16], strides = [1, 1]} : vector<8x16xf32> to vector<1x16xf32>
    %99 = vector.extract_strided_slice %93 {offsets = [3, 0], sizes = [1, 16], strides = [1, 1]} : vector<8x16xf32> to vector<1x16xf32>
    %100 = vector.extract_strided_slice %93 {offsets = [4, 0], sizes = [1, 16], strides = [1, 1]} : vector<8x16xf32> to vector<1x16xf32>
    %101 = vector.extract_strided_slice %93 {offsets = [5, 0], sizes = [1, 16], strides = [1, 1]} : vector<8x16xf32> to vector<1x16xf32>
    %102 = vector.extract_strided_slice %93 {offsets = [6, 0], sizes = [1, 16], strides = [1, 1]} : vector<8x16xf32> to vector<1x16xf32>
    %103 = vector.extract_strided_slice %93 {offsets = [7, 0], sizes = [1, 16], strides = [1, 1]} : vector<8x16xf32> to vector<1x16xf32>
    %104 = tpu.concatenate %96, %97, %98, %99, %100, %101, %102, %103 in 1 : vector<1x16xf32>, vector<1x16xf32>, vector<1x16xf32>, vector<1x16xf32>, vector<1x16xf32>, vector<1x16xf32>, vector<1x16xf32>, vector<1x16xf32> -> vector<1x128xf32>
    %105 = vector.extract_strided_slice %7 {offsets = [0, 48], sizes = [8, 16], strides = [1, 1]} : vector<8x128xbf16> to vector<8x16xbf16>
    %106 = vector.extract_strided_slice %15 {offsets = [0, 48], sizes = [16, 16], strides = [1, 1]} : vector<16x128xbf16> to vector<16x16xbf16>
    %107 = vector.extract_strided_slice %23 {offsets = [0, 48], sizes = [16, 16], strides = [1, 1]} : vector<16x128xbf16> to vector<16x16xbf16>
    %cst_34 = arith.constant dense<0.000000e+00> : vector<8x16xf32>
    %108 = tpu.matmul %105, %106, %cst_34 {dimension_numbers = #tpu.dot_dimension_numbers<[1], [1], [0], [0], [0, 0, 1, 0], [], []>} : vector<8x16xbf16>, vector<16x16xbf16>, vector<8x16xf32> -> vector<8x16xf32>
    %cst_35 = arith.constant 0.0883883461 : f32
    %109 = vector.broadcast %cst_35 : f32 to vector<8x16xf32>
    %110 = arith.mulf %108, %109 : vector<8x16xf32>
    %cst_36 = arith.constant dense<0xFF800000> : vector<8xf32>
    %111 = vector.multi_reduction <maximumf>, %110, %cst_36 [1] : vector<8x16xf32> to vector<8xf32>
    %112 = vector.shape_cast %111 : vector<8xf32> to vector<8x1xf32>
    %113 = vector.broadcast %112 : vector<8x1xf32> to vector<8x16xf32>
    %114 = arith.subf %110, %113 : vector<8x16xf32>
    %115 = math.exp %114 : vector<8x16xf32>
    %cst_37 = arith.constant dense<0.000000e+00> : vector<8xf32>
    %116 = vector.multi_reduction <add>, %115, %cst_37 [1] : vector<8x16xf32> to vector<8xf32>
    %117 = vector.shape_cast %116 : vector<8xf32> to vector<8x1xf32>
    %118 = tpu.reciprocal %117 {approx = true} : vector<8x1xf32> -> vector<8x1xf32>
    %119 = vector.broadcast %118 : vector<8x1xf32> to vector<8x16xf32>
    %120 = arith.mulf %115, %119 : vector<8x16xf32>
    %121 = arith.truncf %120 : vector<8x16xf32> to vector<8x16xbf16>
    %cst_38 = arith.constant dense<0.000000e+00> : vector<8x16xf32>
    %122 = tpu.matmul %121, %107, %cst_38 {dimension_numbers = #tpu.dot_dimension_numbers<[1], [0], [0], [1], [0, 0, 1, 1], [], []>} : vector<8x16xbf16>, vector<16x16xbf16>, vector<8x16xf32> -> vector<8x16xf32>
    %123 = vector.extract_strided_slice %120 {offsets = [0, 0], sizes = [1, 16], strides = [1, 1]} : vector<8x16xf32> to vector<1x16xf32>
    %124 = vector.extract_strided_slice %120 {offsets = [1, 0], sizes = [1, 16], strides = [1, 1]} : vector<8x16xf32> to vector<1x16xf32>
    %125 = vector.extract_strided_slice %120 {offsets = [2, 0], sizes = [1, 16], strides = [1, 1]} : vector<8x16xf32> to vector<1x16xf32>
    %126 = vector.extract_strided_slice %120 {offsets = [3, 0], sizes = [1, 16], strides = [1, 1]} : vector<8x16xf32> to vector<1x16xf32>
    %127 = vector.extract_strided_slice %120 {offsets = [4, 0], sizes = [1, 16], strides = [1, 1]} : vector<8x16xf32> to vector<1x16xf32>
    %128 = vector.extract_strided_slice %120 {offsets = [5, 0], sizes = [1, 16], strides = [1, 1]} : vector<8x16xf32> to vector<1x16xf32>
    %129 = vector.extract_strided_slice %120 {offsets = [6, 0], sizes = [1, 16], strides = [1, 1]} : vector<8x16xf32> to vector<1x16xf32>
    %130 = vector.extract_strided_slice %120 {offsets = [7, 0], sizes = [1, 16], strides = [1, 1]} : vector<8x16xf32> to vector<1x16xf32>
    %131 = tpu.concatenate %123, %124, %125, %126, %127, %128, %129, %130 in 1 : vector<1x16xf32>, vector<1x16xf32>, vector<1x16xf32>, vector<1x16xf32>, vector<1x16xf32>, vector<1x16xf32>, vector<1x16xf32>, vector<1x16xf32> -> vector<1x128xf32>
    %132 = vector.extract_strided_slice %7 {offsets = [0, 64], sizes = [8, 16], strides = [1, 1]} : vector<8x128xbf16> to vector<8x16xbf16>
    %133 = vector.extract_strided_slice %15 {offsets = [0, 64], sizes = [16, 16], strides = [1, 1]} : vector<16x128xbf16> to vector<16x16xbf16>
    %134 = vector.extract_strided_slice %23 {offsets = [0, 64], sizes = [16, 16], strides = [1, 1]} : vector<16x128xbf16> to vector<16x16xbf16>
    %cst_39 = arith.constant dense<0.000000e+00> : vector<8x16xf32>
    %135 = tpu.matmul %132, %133, %cst_39 {dimension_numbers = #tpu.dot_dimension_numbers<[1], [1], [0], [0], [0, 0, 1, 0], [], []>} : vector<8x16xbf16>, vector<16x16xbf16>, vector<8x16xf32> -> vector<8x16xf32>
    %cst_40 = arith.constant 0.0883883461 : f32
    %136 = vector.broadcast %cst_40 : f32 to vector<8x16xf32>
    %137 = arith.mulf %135, %136 : vector<8x16xf32>
    %cst_41 = arith.constant dense<0xFF800000> : vector<8xf32>
    %138 = vector.multi_reduction <maximumf>, %137, %cst_41 [1] : vector<8x16xf32> to vector<8xf32>
    %139 = vector.shape_cast %138 : vector<8xf32> to vector<8x1xf32>
    %140 = vector.broadcast %139 : vector<8x1xf32> to vector<8x16xf32>
    %141 = arith.subf %137, %140 : vector<8x16xf32>
    %142 = math.exp %141 : vector<8x16xf32>
    %cst_42 = arith.constant dense<0.000000e+00> : vector<8xf32>
    %143 = vector.multi_reduction <add>, %142, %cst_42 [1] : vector<8x16xf32> to vector<8xf32>
    %144 = vector.shape_cast %143 : vector<8xf32> to vector<8x1xf32>
    %145 = tpu.reciprocal %144 {approx = true} : vector<8x1xf32> -> vector<8x1xf32>
    %146 = vector.broadcast %145 : vector<8x1xf32> to vector<8x16xf32>
    %147 = arith.mulf %142, %146 : vector<8x16xf32>
    %148 = arith.truncf %147 : vector<8x16xf32> to vector<8x16xbf16>
    %cst_43 = arith.constant dense<0.000000e+00> : vector<8x16xf32>
    %149 = tpu.matmul %148, %134, %cst_43 {dimension_numbers = #tpu.dot_dimension_numbers<[1], [0], [0], [1], [0, 0, 1, 1], [], []>} : vector<8x16xbf16>, vector<16x16xbf16>, vector<8x16xf32> -> vector<8x16xf32>
    %150 = vector.extract_strided_slice %147 {offsets = [0, 0], sizes = [1, 16], strides = [1, 1]} : vector<8x16xf32> to vector<1x16xf32>
    %151 = vector.extract_strided_slice %147 {offsets = [1, 0], sizes = [1, 16], strides = [1, 1]} : vector<8x16xf32> to vector<1x16xf32>
    %152 = vector.extract_strided_slice %147 {offsets = [2, 0], sizes = [1, 16], strides = [1, 1]} : vector<8x16xf32> to vector<1x16xf32>
    %153 = vector.extract_strided_slice %147 {offsets = [3, 0], sizes = [1, 16], strides = [1, 1]} : vector<8x16xf32> to vector<1x16xf32>
    %154 = vector.extract_strided_slice %147 {offsets = [4, 0], sizes = [1, 16], strides = [1, 1]} : vector<8x16xf32> to vector<1x16xf32>
    %155 = vector.extract_strided_slice %147 {offsets = [5, 0], sizes = [1, 16], strides = [1, 1]} : vector<8x16xf32> to vector<1x16xf32>
    %156 = vector.extract_strided_slice %147 {offsets = [6, 0], sizes = [1, 16], strides = [1, 1]} : vector<8x16xf32> to vector<1x16xf32>
    %157 = vector.extract_strided_slice %147 {offsets = [7, 0], sizes = [1, 16], strides = [1, 1]} : vector<8x16xf32> to vector<1x16xf32>
    %158 = tpu.concatenate %150, %151, %152, %153, %154, %155, %156, %157 in 1 : vector<1x16xf32>, vector<1x16xf32>, vector<1x16xf32>, vector<1x16xf32>, vector<1x16xf32>, vector<1x16xf32>, vector<1x16xf32>, vector<1x16xf32> -> vector<1x128xf32>
    %159 = vector.extract_strided_slice %7 {offsets = [0, 80], sizes = [8, 16], strides = [1, 1]} : vector<8x128xbf16> to vector<8x16xbf16>
    %160 = vector.extract_strided_slice %15 {offsets = [0, 80], sizes = [16, 16], strides = [1, 1]} : vector<16x128xbf16> to vector<16x16xbf16>
    %161 = vector.extract_strided_slice %23 {offsets = [0, 80], sizes = [16, 16], strides = [1, 1]} : vector<16x128xbf16> to vector<16x16xbf16>
    %cst_44 = arith.constant dense<0.000000e+00> : vector<8x16xf32>
    %162 = tpu.matmul %159, %160, %cst_44 {dimension_numbers = #tpu.dot_dimension_numbers<[1], [1], [0], [0], [0, 0, 1, 0], [], []>} : vector<8x16xbf16>, vector<16x16xbf16>, vector<8x16xf32> -> vector<8x16xf32>
    %cst_45 = arith.constant 0.0883883461 : f32
    %163 = vector.broadcast %cst_45 : f32 to vector<8x16xf32>
    %164 = arith.mulf %162, %163 : vector<8x16xf32>
    %cst_46 = arith.constant dense<0xFF800000> : vector<8xf32>
    %165 = vector.multi_reduction <maximumf>, %164, %cst_46 [1] : vector<8x16xf32> to vector<8xf32>
    %166 = vector.shape_cast %165 : vector<8xf32> to vector<8x1xf32>
    %167 = vector.broadcast %166 : vector<8x1xf32> to vector<8x16xf32>
    %168 = arith.subf %164, %167 : vector<8x16xf32>
    %169 = math.exp %168 : vector<8x16xf32>
    %cst_47 = arith.constant dense<0.000000e+00> : vector<8xf32>
    %170 = vector.multi_reduction <add>, %169, %cst_47 [1] : vector<8x16xf32> to vector<8xf32>
    %171 = vector.shape_cast %170 : vector<8xf32> to vector<8x1xf32>
    %172 = tpu.reciprocal %171 {approx = true} : vector<8x1xf32> -> vector<8x1xf32>
    %173 = vector.broadcast %172 : vector<8x1xf32> to vector<8x16xf32>
    %174 = arith.mulf %169, %173 : vector<8x16xf32>
    %175 = arith.truncf %174 : vector<8x16xf32> to vector<8x16xbf16>
    %cst_48 = arith.constant dense<0.000000e+00> : vector<8x16xf32>
    %176 = tpu.matmul %175, %161, %cst_48 {dimension_numbers = #tpu.dot_dimension_numbers<[1], [0], [0], [1], [0, 0, 1, 1], [], []>} : vector<8x16xbf16>, vector<16x16xbf16>, vector<8x16xf32> -> vector<8x16xf32>
    %177 = vector.extract_strided_slice %174 {offsets = [0, 0], sizes = [1, 16], strides = [1, 1]} : vector<8x16xf32> to vector<1x16xf32>
    %178 = vector.extract_strided_slice %174 {offsets = [1, 0], sizes = [1, 16], strides = [1, 1]} : vector<8x16xf32> to vector<1x16xf32>
    %179 = vector.extract_strided_slice %174 {offsets = [2, 0], sizes = [1, 16], strides = [1, 1]} : vector<8x16xf32> to vector<1x16xf32>
    %180 = vector.extract_strided_slice %174 {offsets = [3, 0], sizes = [1, 16], strides = [1, 1]} : vector<8x16xf32> to vector<1x16xf32>
    %181 = vector.extract_strided_slice %174 {offsets = [4, 0], sizes = [1, 16], strides = [1, 1]} : vector<8x16xf32> to vector<1x16xf32>
    %182 = vector.extract_strided_slice %174 {offsets = [5, 0], sizes = [1, 16], strides = [1, 1]} : vector<8x16xf32> to vector<1x16xf32>
    %183 = vector.extract_strided_slice %174 {offsets = [6, 0], sizes = [1, 16], strides = [1, 1]} : vector<8x16xf32> to vector<1x16xf32>
    %184 = vector.extract_strided_slice %174 {offsets = [7, 0], sizes = [1, 16], strides = [1, 1]} : vector<8x16xf32> to vector<1x16xf32>
    %185 = tpu.concatenate %177, %178, %179, %180, %181, %182, %183, %184 in 1 : vector<1x16xf32>, vector<1x16xf32>, vector<1x16xf32>, vector<1x16xf32>, vector<1x16xf32>, vector<1x16xf32>, vector<1x16xf32>, vector<1x16xf32> -> vector<1x128xf32>
    %186 = vector.extract_strided_slice %7 {offsets = [0, 96], sizes = [8, 16], strides = [1, 1]} : vector<8x128xbf16> to vector<8x16xbf16>
    %187 = vector.extract_strided_slice %15 {offsets = [0, 96], sizes = [16, 16], strides = [1, 1]} : vector<16x128xbf16> to vector<16x16xbf16>
    %188 = vector.extract_strided_slice %23 {offsets = [0, 96], sizes = [16, 16], strides = [1, 1]} : vector<16x128xbf16> to vector<16x16xbf16>
    %cst_49 = arith.constant dense<0.000000e+00> : vector<8x16xf32>
    %189 = tpu.matmul %186, %187, %cst_49 {dimension_numbers = #tpu.dot_dimension_numbers<[1], [1], [0], [0], [0, 0, 1, 0], [], []>} : vector<8x16xbf16>, vector<16x16xbf16>, vector<8x16xf32> -> vector<8x16xf32>
    %cst_50 = arith.constant 0.0883883461 : f32
    %190 = vector.broadcast %cst_50 : f32 to vector<8x16xf32>
    %191 = arith.mulf %189, %190 : vector<8x16xf32>
    %cst_51 = arith.constant dense<0xFF800000> : vector<8xf32>
    %192 = vector.multi_reduction <maximumf>, %191, %cst_51 [1] : vector<8x16xf32> to vector<8xf32>
    %193 = vector.shape_cast %192 : vector<8xf32> to vector<8x1xf32>
    %194 = vector.broadcast %193 : vector<8x1xf32> to vector<8x16xf32>
    %195 = arith.subf %191, %194 : vector<8x16xf32>
    %196 = math.exp %195 : vector<8x16xf32>
    %cst_52 = arith.constant dense<0.000000e+00> : vector<8xf32>
    %197 = vector.multi_reduction <add>, %196, %cst_52 [1] : vector<8x16xf32> to vector<8xf32>
    %198 = vector.shape_cast %197 : vector<8xf32> to vector<8x1xf32>
    %199 = tpu.reciprocal %198 {approx = true} : vector<8x1xf32> -> vector<8x1xf32>
    %200 = vector.broadcast %199 : vector<8x1xf32> to vector<8x16xf32>
    %201 = arith.mulf %196, %200 : vector<8x16xf32>
    %202 = arith.truncf %201 : vector<8x16xf32> to vector<8x16xbf16>
    %cst_53 = arith.constant dense<0.000000e+00> : vector<8x16xf32>
    %203 = tpu.matmul %202, %188, %cst_53 {dimension_numbers = #tpu.dot_dimension_numbers<[1], [0], [0], [1], [0, 0, 1, 1], [], []>} : vector<8x16xbf16>, vector<16x16xbf16>, vector<8x16xf32> -> vector<8x16xf32>
    %204 = vector.extract_strided_slice %201 {offsets = [0, 0], sizes = [1, 16], strides = [1, 1]} : vector<8x16xf32> to vector<1x16xf32>
    %205 = vector.extract_strided_slice %201 {offsets = [1, 0], sizes = [1, 16], strides = [1, 1]} : vector<8x16xf32> to vector<1x16xf32>
    %206 = vector.extract_strided_slice %201 {offsets = [2, 0], sizes = [1, 16], strides = [1, 1]} : vector<8x16xf32> to vector<1x16xf32>
    %207 = vector.extract_strided_slice %201 {offsets = [3, 0], sizes = [1, 16], strides = [1, 1]} : vector<8x16xf32> to vector<1x16xf32>
    %208 = vector.extract_strided_slice %201 {offsets = [4, 0], sizes = [1, 16], strides = [1, 1]} : vector<8x16xf32> to vector<1x16xf32>
    %209 = vector.extract_strided_slice %201 {offsets = [5, 0], sizes = [1, 16], strides = [1, 1]} : vector<8x16xf32> to vector<1x16xf32>
    %210 = vector.extract_strided_slice %201 {offsets = [6, 0], sizes = [1, 16], strides = [1, 1]} : vector<8x16xf32> to vector<1x16xf32>
    %211 = vector.extract_strided_slice %201 {offsets = [7, 0], sizes = [1, 16], strides = [1, 1]} : vector<8x16xf32> to vector<1x16xf32>
    %212 = tpu.concatenate %204, %205, %206, %207, %208, %209, %210, %211 in 1 : vector<1x16xf32>, vector<1x16xf32>, vector<1x16xf32>, vector<1x16xf32>, vector<1x16xf32>, vector<1x16xf32>, vector<1x16xf32>, vector<1x16xf32> -> vector<1x128xf32>
    %213 = vector.extract_strided_slice %7 {offsets = [0, 112], sizes = [8, 16], strides = [1, 1]} : vector<8x128xbf16> to vector<8x16xbf16>
    %214 = vector.extract_strided_slice %15 {offsets = [0, 112], sizes = [16, 16], strides = [1, 1]} : vector<16x128xbf16> to vector<16x16xbf16>
    %215 = vector.extract_strided_slice %23 {offsets = [0, 112], sizes = [16, 16], strides = [1, 1]} : vector<16x128xbf16> to vector<16x16xbf16>
    %cst_54 = arith.constant dense<0.000000e+00> : vector<8x16xf32>
    %216 = tpu.matmul %213, %214, %cst_54 {dimension_numbers = #tpu.dot_dimension_numbers<[1], [1], [0], [0], [0, 0, 1, 0], [], []>} : vector<8x16xbf16>, vector<16x16xbf16>, vector<8x16xf32> -> vector<8x16xf32>
    %cst_55 = arith.constant 0.0883883461 : f32
    %217 = vector.broadcast %cst_55 : f32 to vector<8x16xf32>
    %218 = arith.mulf %216, %217 : vector<8x16xf32>
    %cst_56 = arith.constant dense<0xFF800000> : vector<8xf32>
    %219 = vector.multi_reduction <maximumf>, %218, %cst_56 [1] : vector<8x16xf32> to vector<8xf32>
    %220 = vector.shape_cast %219 : vector<8xf32> to vector<8x1xf32>
    %221 = vector.broadcast %220 : vector<8x1xf32> to vector<8x16xf32>
    %222 = arith.subf %218, %221 : vector<8x16xf32>
    %223 = math.exp %222 : vector<8x16xf32>
    %cst_57 = arith.constant dense<0.000000e+00> : vector<8xf32>
    %224 = vector.multi_reduction <add>, %223, %cst_57 [1] : vector<8x16xf32> to vector<8xf32>
    %225 = vector.shape_cast %224 : vector<8xf32> to vector<8x1xf32>
    %226 = tpu.reciprocal %225 {approx = true} : vector<8x1xf32> -> vector<8x1xf32>
    %227 = vector.broadcast %226 : vector<8x1xf32> to vector<8x16xf32>
    %228 = arith.mulf %223, %227 : vector<8x16xf32>
    %229 = arith.truncf %228 : vector<8x16xf32> to vector<8x16xbf16>
    %cst_58 = arith.constant dense<0.000000e+00> : vector<8x16xf32>
    %230 = tpu.matmul %229, %215, %cst_58 {dimension_numbers = #tpu.dot_dimension_numbers<[1], [0], [0], [1], [0, 0, 1, 1], [], []>} : vector<8x16xbf16>, vector<16x16xbf16>, vector<8x16xf32> -> vector<8x16xf32>
    %231 = vector.extract_strided_slice %228 {offsets = [0, 0], sizes = [1, 16], strides = [1, 1]} : vector<8x16xf32> to vector<1x16xf32>
    %232 = vector.extract_strided_slice %228 {offsets = [1, 0], sizes = [1, 16], strides = [1, 1]} : vector<8x16xf32> to vector<1x16xf32>
    %233 = vector.extract_strided_slice %228 {offsets = [2, 0], sizes = [1, 16], strides = [1, 1]} : vector<8x16xf32> to vector<1x16xf32>
    %234 = vector.extract_strided_slice %228 {offsets = [3, 0], sizes = [1, 16], strides = [1, 1]} : vector<8x16xf32> to vector<1x16xf32>
    %235 = vector.extract_strided_slice %228 {offsets = [4, 0], sizes = [1, 16], strides = [1, 1]} : vector<8x16xf32> to vector<1x16xf32>
    %236 = vector.extract_strided_slice %228 {offsets = [5, 0], sizes = [1, 16], strides = [1, 1]} : vector<8x16xf32> to vector<1x16xf32>
    %237 = vector.extract_strided_slice %228 {offsets = [6, 0], sizes = [1, 16], strides = [1, 1]} : vector<8x16xf32> to vector<1x16xf32>
    %238 = vector.extract_strided_slice %228 {offsets = [7, 0], sizes = [1, 16], strides = [1, 1]} : vector<8x16xf32> to vector<1x16xf32>
    %239 = tpu.concatenate %231, %232, %233, %234, %235, %236, %237, %238 in 1 : vector<1x16xf32>, vector<1x16xf32>, vector<1x16xf32>, vector<1x16xf32>, vector<1x16xf32>, vector<1x16xf32>, vector<1x16xf32>, vector<1x16xf32> -> vector<1x128xf32>
    %240 = tpu.concatenate %41, %68, %95, %122, %149, %176, %203, %230 in 1 : vector<8x16xf32>, vector<8x16xf32>, vector<8x16xf32>, vector<8x16xf32>, vector<8x16xf32>, vector<8x16xf32>, vector<8x16xf32>, vector<8x16xf32> -> vector<8x128xf32>
    %c0_59 = arith.constant 0 : index
    %c0_60 = arith.constant 0 : index
    %241 = vector.load %arg10[%c0_59, %c0_60] : memref<8x128xf32, #tpu.memory_space<vmem>>, vector<8x128xf32>
    tpu.vector_store %arg10[%c0_59, %c0_60], %240 {strides = array<i32>} : memref<8x128xf32, #tpu.memory_space<vmem>>, vector<8x128xf32>,
    %242 = tpu.concatenate %50, %77, %104, %131, %158, %185, %212, %239 in 0 : vector<1x128xf32>, vector<1x128xf32>, vector<1x128xf32>, vector<1x128xf32>, vector<1x128xf32>, vector<1x128xf32>, vector<1x128xf32>, vector<1x128xf32> -> vector<8x128xf32>
    %c0_61 = arith.constant 0 : index
    %c0_62 = arith.constant 0 : index
    %243 = vector.load %arg11[%c0_61, %c0_62] : memref<8x128xf32, #tpu.memory_space<vmem>>, vector<8x128xf32>
    tpu.vector_store %arg11[%c0_61, %c0_62], %242 {strides = array<i32>} : memref<8x128xf32, #tpu.memory_space<vmem>>, vector<8x128xf32>,
    return
  }
  func.func @transform_0(%arg0: i32) -> (i32, i32) {
    %c0_i32 = arith.constant 0 : i32
    %c0_i32_0 = arith.constant 0 : i32
    return %arg0, %c0_i32 : i32, i32
  }
  func.func @transform_1(%arg0: i32) -> (i32, i32) {
    %c0_i32 = arith.constant 0 : i32
    %c0_i32_0 = arith.constant 0 : i32
    return %arg0, %c0_i32 : i32, i32
  }
  func.func @transform_2(%arg0: i32) -> (i32, i32) {
    %c0_i32 = arith.constant 0 : i32
    %c0_i32_0 = arith.constant 0 : i32
    return %arg0, %c0_i32 : i32, i32
  }
  func.func @transform_3(%arg0: i32) -> (i32, i32) {
    %c0_i32 = arith.constant 0 : i32
    %c0_i32_0 = arith.constant 0 : i32
    %c0_i32_1 = arith.constant 0 : i32
    return %c0_i32, %c0_i32_0 : i32, i32
  }
  func.func @transform_4(%arg0: i32) -> (i32, i32) {
    %c0_i32 = arith.constant 0 : i32
    %c0_i32_0 = arith.constant 0 : i32
    %c0_i32_1 = arith.constant 0 : i32
    return %c0_i32, %c0_i32_0 : i32, i32
  }
  func.func @transform_5(%arg0: i32) -> (i32, i32) {
    %c0_i32 = arith.constant 0 : i32
    %c0_i32_0 = arith.constant 0 : i32
    %c0_i32_1 = arith.constant 0 : i32
    return %c0_i32, %c0_i32_0 : i32, i32
  }
  func.func @transform_6(%arg0: i32) -> (i32, i32) {
    %c0_i32 = arith.constant 0 : i32
    %c0_i32_0 = arith.constant 0 : i32
    %c0_i32_1 = arith.constant 0 : i32
    return %c0_i32, %c0_i32_0 : i32, i32
  }
  func.func @transform_7(%arg0: i32) -> (i32, i32) {
    %c0_i32 = arith.constant 0 : i32
    %c0_i32_0 = arith.constant 0 : i32
    %c0_i32_1 = arith.constant 0 : i32
    return %c0_i32, %c0_i32_0 : i32, i32
  }
  func.func @transform_8(%arg0: i32) -> (i32, i32) {
    %c0_i32 = arith.constant 0 : i32
    %c0_i32_0 = arith.constant 0 : i32
    %c0_i32_1 = arith.constant 0 : i32
    return %c0_i32, %c0_i32_0 : i32, i32
  }
  func.func @transform_9(%arg0: i32) -> (i32, i32) {
    %c0_i32 = arith.constant 0 : i32
    %c0_i32_0 = arith.constant 0 : i32
    return %arg0, %c0_i32 : i32, i32
  }
  func.func @transform_10(%arg0: i32) -> (i32, i32) {
    %c0_i32 = arith.constant 0 : i32
    %c0_i32_0 = arith.constant 0 : i32
    return %c0_i32, %arg0 : i32, i32
  }
}

</mosaic_0001>

<bundles_post_ra>
// kernel: multi_head_attention.1
= control target key start
LH: loop header
LB: loop body
LE: loop exit
PB: predicated region body
PF: predicated region fallthrough
CT: control target
= control target key end

     0   :  { %16 = vsyncpa [#allocation3], 0  ;;  %s3265_s0 = inlined_call_operand.vmem [shape: f32[16,128], index: 0, kind: input, shape index: {}]   ;;  %s3266_s1 = inlined_call_operand.vmem [shape: f32[32,128], index: 1, kind: input, shape index: {}]   ;;  %s3267_s2 = inlined_call_operand.vmem [shape: f32[32,128], index: 2, kind: input, shape index: {}]   ;;  %s3268_s3 = inlined_call_operand.vmem [shape: bf16[128,128], index: 3, kind: input, shape index: {}]   ;;  %s3269_s4 = inlined_call_operand.vmem [shape: f32[1,128], index: 4, kind: input, shape index: {}]   ;;  %s3270_s5 = inlined_call_operand.vmem [shape: bf16[128,128], index: 5, kind: input, shape index: {}]   ;;  %s3271_s6 = inlined_call_operand.vmem [shape: f32[1,128], index: 6, kind: input, shape index: {}]   ;;  %s3272_s7 = inlined_call_operand.vmem [shape: bf16[128,128], index: 7, kind: input, shape index: {}]   ;;  %s3273_s8 = inlined_call_operand.vmem [shape: f32[1,128], index: 8, kind: input, shape index: {}]   ;;  %s3274_s9 = inlined_call_operand.hbm [shape: f32[16,128], index: 9, kind: output, shape index: {0}]   ;;  %s3275_s10 = inlined_call_operand.vmem [shape: f32[8,256], index: 10, kind: output, shape index: {1}]  }
   0x1   :  { %18 = vsyncpa [#allocation3 + $0x1], 0  ;;  %s2626_s13 = smov 0   ;;  %s2628_s14 = smov 0  }
   0x2   :  { %s2630_s15 = smov 0   ;;  %s2632_s16 = smov 0  }
   0x3 LB: > { %3290 = sst [smem:[#allocation5_spill]] %s2555_s15  ;;  %s2647_s17 = sadd.s32 4294967295, %s2559_s16   ;;  %s2559_s16 = sphi %s2632_s16, %s3301_s16   ;;  %s2555_s15 = sphi %s2630_s15, %s3303_s15   ;;  %s2551_s14 = sphi %s2628_s14, %s3305_s14   ;;  %s2547_s13 = sphi %s2626_s13, %s3304_s13  }
   0x4   : > { %s2120_s18 = sadd.s32 4294967294, %s2559_s16   ;;  %s2651_s19 = sadd.s32 1, %s2559_s16  }
   0x5   : > { %3291 = sst [smem:[#allocation6_spill]] %s2651_s19  ;;  %s235_s20 = sadd.s32 1, %s2555_s15 }
   0x6   : > { %s232_s21 = ssub.s32 %s2559_s16, %s2651_s19  ;;  %p245_p0 = scmp.ne.s32.totalorder %s2555_s15, %s2551_s14 }
   0x7   : > { %p233_p1 = scmp.eq.s32.totalorder %s232_s21, 0  ;;  %p246_p2 = scmp.eq.s32.totalorder %s2647_s17, 1 }
   0x8   : > { %p251_p3 = scmp.ne.s32.totalorder %s2551_s14, %s2547_s13  ;;  %p252_p4 = scmp.eq.s32.totalorder %s2120_s18, 1 }
   0x9   : > { %s2662_s22 = scalar_select %p233_p1, %s2555_s15, %s235_s20  }
   0xa   : > { %p2664_p5 = por %p246_p2, %p245_p0  ;;  %p2668_p6 = por %p252_p4, %p251_p3 }
   0xb   : > { %3292 = sst [smem:[#allocation7_spill]] %s2662_s22  ;;  %p2123_p7 = scmp.ge.s32.totalorder %s2559_s16, 1 }
   0xc   : > { %p339_p8 = scmp.lt.s32.totalorder %s2559_s16, 3 }
   0xe   : > { %p340_p9 = pnand %p2123_p7, %p339_p8 }
   0xf   : > { %v2441_v0 = vld [vmem:[%s3270_s5] sm:$0xff] (!%p340_p9)   ;;  %v2561_v1 = vmov (!%p340_p9), 0.0   ;;  %v2442_v2 = vld [vmem:[%s3270_s5 + $0x8] sm:$0xff] (!%p340_p9)   ;;  %vm2562_vm0 = vmmov (!%p340_p9), 0   ;;  %v2444_v5 = vld [vmem:[%s3270_s5 + $0x10] sm:$0xff] (!%p340_p9)   ;;  %s2126_s21 = sshll.u32 (!%p340_p9), %s2647_s17, 1 }
  0x10   : > { %343 = sbr.rel (%p340_p9) target bundleno = 1763 (0x6e3), region = 56  ;;  %2257 = vmatprep.subr.bf16.mxu1 (!%p340_p9), %v2561_v1  ;;  %2237 = vmatprep.subr.bf16.mxu0 (!%p340_p9), %v2561_v1  ;;  %v2443_v3 = vld [vmem:[%s3268_s3] sm:$0xff] (!%p340_p9)   ;;  %v2445_v4 = vld [vmem:[%s3268_s3 + $0x8] sm:$0xff] (!%p340_p9)   ;;  %v2447_v6 = vld [vmem:[%s3268_s3 + $0x10] sm:$0xff] (!%p340_p9)   ;;  %p395_p10 = scmp.lt.s32.totalorder (!%p340_p9), %s2126_s21, 3  ;;  %vm757_vm1 = vcmask (!%p340_p9), 130048  }
  0x11   : > { %2258 = vmatpush3.bf16.msra.mxu1 (!%p340_p9), %v2441_v0  ;;  %2273 = vmatprep.mubr.msk.bf16.mxu1 (!%p340_p9), %vm2562_vm0, %v2561_v1  ;;  %v2446_v7 = vld [vmem:[%s3270_s5 + $0x18] sm:$0xff] (!%p340_p9)   ;;  %p390_p11 = scmp.lt.s32.totalorder (!%p340_p9), %s2647_s17, 1  ;;  %v2448_v9 = vld [vmem:[%s3270_s5 + $0x20] sm:$0xff] (!%p340_p9)   ;;  %v2450_v11 = vld [vmem:[%s3270_s5 + $0x28] sm:$0xff] (!%p340_p9)   ;;  %s3284_s29 = smov (!%p340_p9), 112   ;;  %vm890_vm2 = vcmask (!%p340_p9), 261120  }
  0x12   : > { %2259 = vmatprep.subr.bf16.mxu1 (!%p340_p9), %v2561_v1  ;;  %2253 = vmatprep.mubr.msk.bf16.mxu0 (!%p340_p9), %vm2562_vm0, %v2561_v1  ;;  %v2449_v8 = vld [vmem:[%s3268_s3 + $0x18] sm:$0xff] (!%p340_p9)   ;;  %v2451_v10 = vld [vmem:[%s3268_s3 + $0x20] sm:$0xff] (!%p340_p9)   ;;  %v2453_v12 = vld [vmem:[%s3268_s3 + $0x28] sm:$0xff] (!%p340_p9)   ;;  %s2564_s30 = smov (!%p340_p9), 96   ;;  %s3280_s12 = smov (!%p340_p9), 64   ;;  %vm892_vm3 = vcmask (!%p340_p9), 392192  }
  0x13   : > { %2238 = vmatpush3.bf16.msra.mxu0 (!%p340_p9), %v2443_v3  ;;  %v2452_v13 = vld [vmem:[%s3270_s5 + $0x30] sm:$0xff] (!%p340_p9)   ;;  %v2454_v15 = vld [vmem:[%s3270_s5 + $0x38] sm:$0xff] (!%p340_p9)   ;;  %v2140_v22 = vld [vmem:[%s3271_s6] ss:$0 sm:$0xff] (!%p340_p9)  ;;  %s2567_s20 = smov (!%p340_p9), 48   ;;  %s3288_s26 = smov (!%p340_p9), 32  }
  0x14   : > { %2239 = vmatprep.subr.bf16.mxu0 (!%p340_p9), %v2561_v1  ;;  %v2455_v14 = vld [vmem:[%s3268_s3 + $0x30] sm:$0xff] (!%p340_p9)   ;;  %v2456_v18 = vld [vmem:[%s3268_s3 + $0x38] sm:$0xff] (!%p340_p9)   ;;  %v2131_v24 = vld [vmem:[%s3269_s4] ss:$0 sm:$0xff] (!%p340_p9)  ;;  %s3286_s15 = smov (!%p340_p9), 16   ;;  %s3296_s22 = smov (!%p340_p9), 16  }
  0x15   : > { %2260 = vmatpush3.bf16.msra.mxu1 (!%p340_p9), %v2442_v2  ;;  %v2457_v38 = vld [vmem:[%s3272_s7] sm:$0xff] (!%p340_p9)   ;;  %v2458_v39 = vld [vmem:[%s3272_s7 + $0x8] sm:$0xff] (!%p340_p9)   ;;  %v2459_v40 = vld [vmem:[%s3272_s7 + $0x10] sm:$0xff] (!%p340_p9)   ;;  %vm894_vm4 = vcmask (!%p340_p9), 523264   ;;  %vm896_vm5 = vcmask (!%p340_p9), 654336   ;;  %vm898_vm6 = vcmask (!%p340_p9), 785408  }
  0x16   : > { %2261 = vmatprep.subr.bf16.mxu1 (!%p340_p9), %v2561_v1  ;;  %v2460_v41 = vld [vmem:[%s3272_s7 + $0x18] sm:$0xff] (!%p340_p9)   ;;  %v2461_v42 = vld [vmem:[%s3272_s7 + $0x20] sm:$0xff] (!%p340_p9)   ;;  %v2462_v43 = vld [vmem:[%s3272_s7 + $0x28] sm:$0xff] (!%p340_p9)   ;;  %vm900_vm7 = vcmask (!%p340_p9), 916480   ;;  %vm1977_vm8 = vcmask (!%p340_p9), 1040384   ;;  %vm1979_vm9 = vcmask (!%p340_p9), 1041408  }
  0x17   : > { %2240 = vmatpush3.bf16.msra.mxu0 %v2445_v4  ;;  %s3307_s21 = smov (!%p395_p10, %s2126_s21), 3  ;;  %v2463_v44 = vld [vmem:[%s3272_s7 + $0x30] sm:$0xff]   ;;  %v2464_v45 = vld [vmem:[%s3272_s7 + $0x38] sm:$0xff]   ;;  %v2149_v62 = vld [vmem:[%s3273_s8] ss:$0 sm:$0xff]  ;;  %vm1981_vm10 = vcmask 1042432  }
  0x18   : > { %2241 = vmatprep.subr.bf16.mxu0 %v2561_v1  ;;  %s2722_s25 = scalar_select %p390_p11, %s2647_s17, 1  ;;  %vm1983_vm11 = vcmask 1043456   ;;  %vm1985_vm12 = vcmask 1044480   ;;  %vm1987_vm13 = vcmask 1045504   ;;  %vm1989_vm14 = vcmask 1046528  }
  0x19   : > { %2262 = vmatpush3.bf16.msra.mxu1 %v2444_v5  ;;  %s2127_s28 = sshll.u32 %s3307_s21, 3 }
  0x1a   : > { %2263 = vmatprep.subr.bf16.mxu1 %v2561_v1  ;;  %s3279_s18 = sshll.u32 %s2722_s25, 3  ;;  %s398_s27 = scalar_lea.vmem %s3266_s1, %s2127_s28 }
  0x1b   : > { %2242 = vmatpush3.bf16.msra.mxu0 %v2447_v6  ;;  %s393_s11 = scalar_lea.vmem %s3265_s0, %s3279_s18  ;;  %v525_v16 = vld [vmem:[%s398_s27] sm:$0xff]  ;;  %v526_v17 = vld [vmem:[%s398_s27 + $0x8] sm:$0xff]  ;;  %s404_s18 = scalar_lea.vmem %s3267_s2, %s2127_s28 }
  0x1c   : > { %2243 = vmatprep.subr.bf16.mxu0 %v2561_v1  ;;  %v411_v19 = vld [vmem:[%s393_s11] sm:$0xff]  ;;  %v527_v20 = vpack.c.bf16 %v526_v17, %v525_v16  ;;  %s3282_s11 = smov 80   ;;  %v642_v47 = vld [vmem:[%s404_s18 + $0x8] sm:$0xff] }
  0x1d   : > { %2264 = vmatpush3.bf16.msra.mxu1 %v2446_v7  ;;  %v412_v21 = vpack.c.bf16 %v411_v19, %v411_v19  ;;  %v641_v46 = vld [vmem:[%s404_s18] sm:$0xff] }
  0x1e   : > { %2265 = vmatprep.subr.bf16.mxu1 %v2561_v1  ;;  %v643_v48 = vpack.c.bf16 %v642_v47, %v641_v46 }
  0x1f   : > { %2244 = vmatpush3.bf16.msra.mxu0 %v2449_v8 }
  0x20   : > { %2245 = vmatprep.subr.bf16.mxu0 %v2561_v1 }
  0x21   : > { %2266 = vmatpush3.bf16.msra.mxu1 %v2448_v9 }
  0x22   : > { %2267 = vmatprep.subr.bf16.mxu1 %v2561_v1 }
  0x23   : > { %2246 = vmatpush3.bf16.msra.mxu0 %v2451_v10 }
  0x24   : > { %2247 = vmatprep.subr.bf16.mxu0 %v2561_v1 }
  0x25   : > { %2268 = vmatpush3.bf16.msra.mxu1 %v2450_v11 }
  0x26   : > { %2269 = vmatprep.subr.bf16.mxu1 %v2561_v1 }
  0x27   : > { %2248 = vmatpush3.bf16.msra.mxu0 %v2453_v12 }
  0x28   : > { %2249 = vmatprep.subr.bf16.mxu0 %v2561_v1 }
  0x29   : > { %2270 = vmatpush3.bf16.msra.mxu1 %v2452_v13 }
  0x2a   : > { %2271 = vmatprep.subr.bf16.mxu1 %v2561_v1 }
  0x2b   : > { %2250 = vmatpush3.bf16.msra.mxu0 %v2455_v14 }
  0x2c   : > { %2251 = vmatprep.subr.bf16.mxu0 %v2561_v1 }
  0x2d   : > { %2272 = vmatpush3.bf16.msra.mxu1 %v2454_v15 }
  0x2e   : > { %2297 = vmatprep.subr.bf16.mxu1 %v2561_v1 }
  0x2f   : > { %2252 = vmatpush3.bf16.msra.mxu0 %v2456_v18 }
  0x30   : > { %2274 = vmatmul.mubr.bf16.vlgmr.msra.gmra.mrb[0].mxu1 %v527_v20  ;;  %2277 = vmatprep.subr.bf16.mxu0 %v2561_v1 }
  0x31   : > { %2299 = vmatprep.mubr.msk.bf16.mxu1 %vm2562_vm0, %v2561_v1 }
  0x32   : > { %2254 = vmatmul.mubr.bf16.vlgmr.msra.gmra.mrb[0].mxu0 %v412_v21 }
  0x33   : > { %2293 = vmatprep.mubr.msk.bf16.mxu0 %vm2562_vm0, %v2561_v1  ;;  %2278 = vmatpush3.bf16.msra.mxu0 %v2457_v38 }
  0x34   : > { %2279 = vmatprep.subr.bf16.mxu0 %v2561_v1 }
  0x37   : > { %2280 = vmatpush3.bf16.msra.mxu0 %v2458_v39 }
  0x38   : > { %2281 = vmatprep.subr.bf16.mxu0 %v2561_v1 }
  0x3b   : > { %2282 = vmatpush3.bf16.msra.mxu0 %v2459_v40 }
  0x3c   : > { %2283 = vmatprep.subr.bf16.mxu0 %v2561_v1 }
  0x3f   : > { %2284 = vmatpush3.bf16.msra.mxu0 %v2460_v41 }
  0x40   : > { %2285 = vmatprep.subr.bf16.mxu0 %v2561_v1 }
  0x43   : > { %2286 = vmatpush3.bf16.msra.mxu0 %v2461_v42 }
  0x44   : > { %2287 = vmatprep.subr.bf16.mxu0 %v2561_v1 }
  0x47   : > { %2288 = vmatpush3.bf16.msra.mxu0 %v2462_v43 }
  0x48   : > { %2289 = vmatprep.subr.bf16.mxu0 %v2561_v1 }
  0x4b   : > { %2290 = vmatpush3.bf16.msra.mxu0 %v2463_v44 }
  0x4c   : > { %2291 = vmatprep.subr.bf16.mxu0 %v2561_v1 }
  0x4f   : > { %2292 = vmatpush3.bf16.msra.mxu0 %v2464_v45 }
  0x50   : > { %2321 = vmatprep.subr.bf16.mxu0 %v2561_v1 }
  0x52   : > { %2294 = vmatmul.mubr.bf16.vlgmr.msra.gmra.mrb[4].mxu0 %v643_v48 }
  0x53   : > { %2323 = vmatprep.mubr.msk.bf16.mxu0 %vm2562_vm0, %v2561_v1 }
 0x103   : > { %v633_v23 = vpop.f32.mrb[0].mxu1 }
 0x104   : > { %v2275_v25 = vpop.f32.mrb[1].mxu1  ;;  %v634_v28 = vadd.f32 %v2140_v22, %v633_v23 }
 0x105   : > { %v636_v26 = vpop.f32.mrb[2].mxu1  ;;  %v518_v27 = vpop.f32.mrb[0].mxu0 }
 0x106   : > { %v637_v29 = vadd.f32 %v2140_v22, %v636_v26  ;;  %v2276_v30 = vpop.f32.mrb[3].mxu1  ;;  %v519_v31 = vadd.f32 %v2131_v24, %v518_v27  ;;  %v2255_v32 = vpop.f32.mrb[1].mxu0 }
 0x107   : > { %v521_v33 = vpop.f32.mrb[2].mxu0 }
 0x108   : > { %v2773_v34 = vpack.c.bf16 %v637_v29, %v634_v28  ;;  %v2256_v35 = vpop.f32.mrb[3].mxu0  ;;  %v2775_v36 = vpack.c.bf16 %v519_v31, %v519_v31 }
 0x10a   : > { %906 = vrot.lane.b32.xlu1 %v2773_v34, %s3284_s29  ;;  %v762_v37 = vsel %vm757_vm1, %v2773_v34, 0 }
 0x10b   : > { %2298 = vmatpush3.bf16.xpose.msra.mxu1 %v762_v37 }
 0x10c   : > { %2303 = vmatprep.subr.bf16.mxu1 %v2561_v1 }
 0x10e   : > { %903 = vrot.lane.b32.xlu1 %v2775_v36, %s3284_s29  ;;  %s3299_s29 = smov 64  }
 0x112   : > { %1050 = vrot.lane.b32.xlu1 %v2775_v36, %s2564_s30  ;;  %2300 = vmatmul.mubr.msk.bf16.vlgmr.msra.gmra.mrb[4].mxu1 %vm757_vm1, %v2775_v36 }
 0x113   : > { %2305 = vmatprep.mubr.msk.bf16.mxu1 %vm2562_vm0, %v2561_v1 }
 0x116   : > { %1197 = vrot.lane.b32.xlu1 %v2773_v34, %s3282_s11 }
 0x11a   : > { %1195 = vrot.lane.b32.xlu1 %v2775_v36, %s3282_s11  ;;  %s3297_s11 = smov 112  }
 0x11e   : > { %1342 = vrot.lane.b32.xlu1 %v2773_v34, %s3280_s12 }
 0x122   : > { %1340 = vrot.lane.b32.xlu1 %v2775_v36, %s3280_s12  ;;  %s3298_s12 = smov 80  }
 0x125   : > { %v749_v60 = vpop.f32.mrb[4].mxu0 }
 0x126   : > { %1487 = vrot.lane.b32.xlu1 %v2773_v34, %s2567_s20  ;;  %v2295_v61 = vpop.f32.mrb[5].mxu0  ;;  %v750_v0 = vadd.f32 %v2149_v62, %v749_v60 }
 0x127   : > { %v752_v63 = vpop.f32.mrb[6].mxu0 }
 0x128   : > { %v753_v2 = vadd.f32 %v2149_v62, %v752_v63  ;;  %v2296_v3 = vpop.f32.mrb[7].mxu0 }
 0x12a   : > { %1632 = vrot.lane.b32.xlu1 %v2773_v34, %s3288_s26  ;;  %v2848_v4 = vpack.c.bf16 %v753_v2, %v750_v0  ;;  %s3295_s26 = smov 32  }
 0x12c   : > { %2304 = vmatpush3.bf16.msra.mxu1 %v2848_v4 }
 0x12d   : > { %2309 = vmatprep.subr.bf16.mxu1 %v2561_v1 }
 0x12e   : > { %1777 = vrot.lane.b32.xlu1 %v2773_v34, %s3286_s15  ;;  %s3300_s15 = sshll.u32 %s2722_s25, 3  ;;  %s381_s25 = sand.u32 1, %s2551_s14  }
 0x12f   : > { %s409_s19 = scalar_lea.vmem %s3275_s10, %s3300_s15 }
 0x17c   : > { %v907_v5 = vpop.permute.xlu1 %906 }
 0x17d   : > { %v912_v18 = vsel %vm757_vm1, %v907_v5, 0 }
 0x180   : > { %v904_v6 = vpop.permute.xlu1 %903 }
 0x184   : > { %v1051_v7 = vpop.permute.xlu1 %1050 }
 0x188   : > { %v1198_v9 = vpop.permute.xlu1 %1197 }
 0x189   : > { %v1203_v15 = vsel %vm757_vm1, %v1198_v9, 0 }
 0x18c   : > { %v1196_v12 = vpop.permute.xlu1 %1195 }
 0x190   : > { %v1343_v16 = vpop.permute.xlu1 %1342 }
 0x191   : > { %v1348_v20 = vsel %vm757_vm1, %v1343_v16, 0 }
 0x194   : > { %v1341_v19 = vpop.permute.xlu1 %1340 }
 0x198   : > { %v1488_v21 = vpop.permute.xlu1 %1487 }
 0x199   : > { %v1493_v22 = vsel %vm757_vm1, %v1488_v21, 0 }
 0x19c   : > { %v1633_v23 = vpop.permute.xlu1 %1632 }
 0x19d   : > { %v1638_v25 = vsel %vm757_vm1, %v1633_v23, 0 }
 0x1a0   : > { %v1778_v26 = vpop.permute.xlu1 %1777 }
 0x1a1   : > { %v1783_v28 = vsel %vm757_vm1, %v1778_v26, 0 }
 0x1e5   : > { %v798_v49 = vpop.f32.mrb[4].mxu1 }
 0x1e6   : > { %v804_v50 = vmul.f32 0.088388346, %v798_v49  ;;  %v2301_v51 = vpop.f32.mrb[5].mxu1 }
 0x1e7   : > { %v801_v52 = vpop.f32.mrb[6].mxu1 }
 0x1e8   : > { %v2302_v53 = vpop.f32.mrb[7].mxu1  ;;  %v805_v54 = vsel %vm757_vm1, %v804_v50, -inf }
 0x1e9   : > { %806 = vmax.xlane.f32.xlu0 %v805_v54 }
 0x276   : > { %v807_v55 = vpop.xlane.xlu0 %806 }
 0x277   : > { %v808_v56 = vsub.f32 %v804_v50, %v807_v55 }
 0x279   : > { %v809_v57 = vmul.f32 1.442695, %v808_v56 }
 0x27b   : > { %2465 = vpow2.f32 %v809_v57 }
 0x285   : > { %v2466_v58 = vpop.eup %2465 }
 0x286   : > { %v811_v59 = vsel %vm757_vm1, %v2466_v58, 0.0 }
 0x287   : > { %812 = vadd.xlane.f32.xlu0 %v811_v59 }
 0x29d   : > { %1052 = vrot.lane.b32.xlu0 %v2773_v34, %s2564_s30 }
 0x2a1   : > { %1485 = vrot.lane.b32.xlu0 %v2775_v36, %s2567_s20 }
 0x2a5   : > { %1630 = vrot.lane.b32.xlu0 %v2775_v36, %s3295_s26 }
 0x2a9   : > { %1775 = vrot.lane.b32.xlu0 %v2775_v36, %s3296_s22 }
 0x314   : > { %v813_v8 = vpop.xlane.xlu0 %812 }
 0x315   : > { %2467 = vrcp.f32 %v813_v8 }
 0x318   : > { %v1053_v10 = vpop.permute.xlu0 %1052 }
 0x319   : > { %v1058_v11 = vsel %vm757_vm1, %v1053_v10, 0 }
 0x31a   : > { %2322 = vmatpush3.bf16.xpose.msra.mxu0 %v1058_v11 }
 0x31b   : > { %2333 = vmatprep.subr.bf16.mxu0 %v2561_v1 }
 0x31c   : > { %v1486_v24 = vpop.permute.xlu0 %1485 }
 0x31f   : > { %v2468_v13 = vpop.eup %2467 }
 0x320   : > { %v2862_v14 = vmul.f32 %v2468_v13, %v2466_v58  ;;  %v1631_v27 = vpop.permute.xlu0 %1630 }
 0x321   : > { %2324 = vmatmul.mubr.msk.bf16.vlgmr.msra.gmra.mrb[8].mxu0 %vm757_vm1, %v1051_v7 }
 0x322   : > { %2334 = vmatpush3.bf16.xpose.msra.mxu0 %v1203_v15  ;;  %v816_v17 = vpack.c.bf16 %v2862_v14, %v2862_v14  ;;  %2335 = vmatprep.mubr.msk.bf16.mxu0 %vm2562_vm0, %v2561_v1 }
 0x323   : > { %2345 = vmatprep.subr.bf16.mxu0 %v2561_v1 }
 0x324   : > { %2306 = vmatmul.mubr.msk.bf16.vlgmr.msra.gmra.mrb[8].mxu1 %vm757_vm1, %v816_v17  ;;  %v1776_v29 = vpop.permute.xlu0 %1775 }
 0x325   : > { %2310 = vmatpush3.bf16.xpose.msra.mxu1 %v912_v18  ;;  %2311 = vmatprep.mubr.msk.bf16.mxu1 %vm2562_vm0, %v2561_v1 }
 0x326   : > { %2315 = vmatprep.subr.bf16.mxu1 %v2561_v1 }
 0x329   : > { %2336 = vmatmul.mubr.msk.bf16.vlgmr.msra.gmra.mrb[12].mxu0 %vm757_vm1, %v1196_v12 }
 0x32a   : > { %2346 = vmatpush3.bf16.xpose.msra.mxu0 %v1348_v20  ;;  %2347 = vmatprep.mubr.msk.bf16.mxu0 %vm2562_vm0, %v2561_v1 }
 0x32b   : > { %2357 = vmatprep.subr.bf16.mxu0 %v2561_v1 }
 0x32c   : > { %2312 = vmatmul.mubr.msk.bf16.vlgmr.msra.gmra.mrb[12].mxu1 %vm757_vm1, %v904_v6 }
 0x32d   : > { %2317 = vmatprep.mubr.msk.bf16.mxu1 %vm2562_vm0, %v2561_v1 }
 0x331   : > { %2348 = vmatmul.mubr.msk.bf16.vlgmr.msra.gmra.mrb[16].mxu0 %vm757_vm1, %v1341_v19 }
 0x332   : > { %2358 = vmatpush3.bf16.xpose.msra.mxu0 %v1493_v22  ;;  %2359 = vmatprep.mubr.msk.bf16.mxu0 %vm2562_vm0, %v2561_v1 }
 0x333   : > { %2369 = vmatprep.subr.bf16.mxu0 %v2561_v1 }
 0x339   : > { %2360 = vmatmul.mubr.msk.bf16.vlgmr.msra.gmra.mrb[20].mxu0 %vm757_vm1, %v1486_v24 }
 0x33a   : > { %2370 = vmatpush3.bf16.xpose.msra.mxu0 %v1638_v25  ;;  %2371 = vmatprep.mubr.msk.bf16.mxu0 %vm2562_vm0, %v2561_v1 }
 0x33b   : > { %2381 = vmatprep.subr.bf16.mxu0 %v2561_v1 }
 0x341   : > { %2372 = vmatmul.mubr.msk.bf16.vlgmr.msra.gmra.mrb[24].mxu0 %vm757_vm1, %v1631_v27 }
 0x342   : > { %2382 = vmatpush3.bf16.xpose.msra.mxu0 %v1783_v28  ;;  %2383 = vmatprep.mubr.msk.bf16.mxu0 %vm2562_vm0, %v2561_v1 }
 0x349   : > { %2384 = vmatmul.mubr.msk.bf16.vlgmr.msra.gmra.mrb[28].mxu0 %vm757_vm1, %v1776_v29 }
 0x3f4   : > { %v1094_v30 = vpop.f32.mrb[8].mxu0 }
 0x3f5   : > { %v1100_v31 = vmul.f32 0.088388346, %v1094_v30  ;;  %v2325_v32 = vpop.f32.mrb[9].mxu0 }
 0x3f6   : > { %v1097_v33 = vpop.f32.mrb[10].mxu0 }
 0x3f7   : > { %v2899_v34 = vpop.f32.mrb[8].mxu1  ;;  %v2326_v35 = vpop.f32.mrb[11].mxu0  ;;  %v1101_v36 = vsel %vm757_vm1, %v1100_v31, -inf }
 0x3f8   : > { %v2307_v37 = vpop.f32.mrb[9].mxu1  ;;  %1102 = vmax.xlane.f32.xlu0 %v1101_v36 }
 0x3f9   : > { %v857_v38 = vpop.f32.mrb[10].mxu1 }
 0x3fa   : > { %v2308_v39 = vpop.f32.mrb[11].mxu1 }
 0x3fc   : > { %v1239_v40 = vpop.f32.mrb[12].mxu0 }
 0x3fd   : > { %v1245_v41 = vmul.f32 0.088388346, %v1239_v40  ;;  %v2337_v42 = vpop.f32.mrb[13].mxu0 }
 0x3fe   : > { %v1242_v43 = vpop.f32.mrb[14].mxu0 }
 0x3ff   : > { %v948_v44 = vpop.f32.mrb[12].mxu1  ;;  %v2338_v45 = vpop.f32.mrb[15].mxu0  ;;  %v1246_v46 = vsel %vm757_vm1, %v1245_v41, -inf }
 0x400   : > { %v954_v47 = vmul.f32 0.088388346, %v948_v44  ;;  %v2313_v48 = vpop.f32.mrb[13].mxu1  ;;  %1247 = vmax.xlane.f32.xlu0 %v1246_v46 }
 0x401   : > { %v951_v49 = vpop.f32.mrb[14].mxu1 }
 0x402   : > { %v2314_v50 = vpop.f32.mrb[15].mxu1  ;;  %v955_v51 = vsel %vm757_vm1, %v954_v47, -inf }
 0x403   : > { %956 = vmax.xlane.f32.xlu1 %v955_v51  ;;  %v861_v51 = vrot.slane %v2862_v14, 1 }
 0x404   : > { %v1384_v52 = vpop.f32.mrb[16].mxu0 }
 0x405   : > { %v1390_v53 = vmul.f32 0.088388346, %v1384_v52  ;;  %v2349_v54 = vpop.f32.mrb[17].mxu0  ;;  %v865_v52 = vrot.slane %v2862_v14, 2 }
 0x406   : > { %v1387_v55 = vpop.f32.mrb[18].mxu0  ;;  %v881_v54 = vrot.slane %v2862_v14, 6 }
 0x407   : > { %v2350_v56 = vpop.f32.mrb[19].mxu0  ;;  %v1391_v57 = vsel %vm757_vm1, %v1390_v53, -inf  ;;  %v869_v55 = vrot.slane %v2862_v14, 3 }
 0x408   : > { %1392 = vmax.xlane.f32.xlu1 %v1391_v57  ;;  %v877_v56 = vrot.slane %v2862_v14, 5  ;;  %v885_v57 = vrot.slane %v2862_v14, 7 }
 0x40c   : > { %v1529_v58 = vpop.f32.mrb[20].mxu0 }
 0x40d   : > { %v1535_v59 = vmul.f32 0.088388346, %v1529_v58  ;;  %v2361_v60 = vpop.f32.mrb[21].mxu0 }
 0x40e   : > { %v1532_v61 = vpop.f32.mrb[22].mxu0 }
 0x40f   : > { %v2362_v62 = vpop.f32.mrb[23].mxu0  ;;  %v1536_v63 = vsel %vm757_vm1, %v1535_v59, -inf }
 0x410   : > { %1537 = vmax.xlane.f32.xlu0 %v1536_v63 }
 0x414   : > { %v1674_v0 = vpop.f32.mrb[24].mxu0 }
 0x415   : > { %v1680_v2 = vmul.f32 0.088388346, %v1674_v0  ;;  %v2373_v3 = vpop.f32.mrb[25].mxu0 }
 0x416   : > { %v1677_v5 = vpop.f32.mrb[26].mxu0 }
 0x417   : > { %v2374_v6 = vpop.f32.mrb[27].mxu0  ;;  %v1681_v7 = vsel %vm757_vm1, %v1680_v2, -inf }
 0x418   : > { %1682 = vmax.xlane.f32.xlu1 %v1681_v7 }
 0x41c   : > { %v1819_v8 = vpop.f32.mrb[28].mxu0 }
 0x41d   : > { %v1825_v9 = vmul.f32 0.088388346, %v1819_v8  ;;  %v2385_v10 = vpop.f32.mrb[29].mxu0 }
 0x41e   : > { %v1822_v11 = vpop.f32.mrb[30].mxu0 }
 0x41f   : > { %v2386_v12 = vpop.f32.mrb[31].mxu0  ;;  %v1826_v13 = vsel %vm757_vm1, %v1825_v9, -inf }
 0x420   : > { %1827 = vmax.xlane.f32.xlu0 %v1826_v13 }
 0x485   : > { %v1103_v15 = vpop.xlane.xlu0 %1102 }
 0x486   : > { %v1104_v16 = vsub.f32 %v1100_v31, %v1103_v15 }
 0x488   : > { %v1105_v17 = vmul.f32 1.442695, %v1104_v16 }
 0x48a   : > { %2469 = vpow2.f32 %v1105_v17 }
 0x48d   : > { %v1248_v18 = vpop.xlane.xlu0 %1247 }
 0x48e   : > { %v1249_v19 = vsub.f32 %v1245_v41, %v1248_v18 }
 0x490   : > { %v1250_v20 = vmul.f32 1.442695, %v1249_v19  ;;  %v957_v21 = vpop.xlane.xlu1 %956 }
 0x491   : > { %v958_v22 = vsub.f32 %v954_v47, %v957_v21 }
 0x492   : > { %2471 = vpow2.f32 %v1250_v20 }
 0x493   : > { %v959_v23 = vmul.f32 1.442695, %v958_v22 }
 0x494   : > { %v2908_v24 = vpop.eup %2469 }
 0x495   : > { %2473 = vpow2.f32 %v959_v23  ;;  %v1393_v25 = vpop.xlane.xlu1 %1392  ;;  %v1107_v26 = vsel %vm757_vm1, %v2908_v24, 0.0 }
 0x496   : > { %v1394_v27 = vsub.f32 %v1390_v53, %v1393_v25  ;;  %1108 = vadd.xlane.f32.xlu0 %v1107_v26  ;;  %v873_v53 = vrot.slane %v2862_v14, 4 }
 0x498   : > { %v1395_v28 = vmul.f32 1.442695, %v1394_v27 }
 0x49a   : > { %2475 = vpow2.f32 %v1395_v28 }
 0x49c   : > { %v2912_v29 = vpop.eup %2471 }
 0x49d   : > { %v1538_v30 = vpop.xlane.xlu0 %1537  ;;  %v1252_v31 = vsel %vm757_vm1, %v2912_v29, 0.0 }
 0x49e   : > { %v1539_v32 = vsub.f32 %v1535_v59, %v1538_v30  ;;  %1253 = vadd.xlane.f32.xlu1 %v1252_v31 }
 0x49f   : > { %v2916_v33 = vpop.eup %2473 }
 0x4a0   : > { %v1540_v35 = vmul.f32 1.442695, %v1539_v32  ;;  %v961_v36 = vsel %vm757_vm1, %v2916_v33, 0.0 }
 0x4a2   : > { %2477 = vpow2.f32 %v1540_v35  ;;  %962 = vadd.xlane.f32.xlu1 %v961_v36 }
 0x4a4   : > { %v2920_v37 = vpop.eup %2475 }
 0x4a5   : > { %v1397_v38 = vsel %vm757_vm1, %v2920_v37, 0.0  ;;  %v1683_v41 = vpop.xlane.xlu1 %1682 }
 0x4a6   : > { %1398 = vadd.xlane.f32.xlu0 %v1397_v38  ;;  %v1684_v42 = vsub.f32 %v1680_v2, %v1683_v41 }
 0x4a8   : > { %v1685_v43 = vmul.f32 1.442695, %v1684_v42 }
 0x4aa   : > { %2479 = vpow2.f32 %v1685_v43 }
 0x4ac   : > { %v2924_v39 = vpop.eup %2477 }
 0x4ad   : > { %v1542_v40 = vsel %vm757_vm1, %v2924_v39, 0.0  ;;  %v1828_v44 = vpop.xlane.xlu0 %1827 }
 0x4ae   : > { %1543 = vadd.xlane.f32.xlu0 %v1542_v40  ;;  %v1829_v45 = vsub.f32 %v1825_v9, %v1828_v44 }
 0x4b0   : > { %v1830_v47 = vmul.f32 1.442695, %v1829_v45 }
 0x4b2   : > { %2481 = vpow2.f32 %v1830_v47 }
 0x4b3   : > { %968 = vrot.lane.b32.xlu1 %v2848_v4, %s3297_s11 }
 0x4b4   : > { %v2934_v46 = vpop.eup %2479 }
 0x4b5   : > { %v1687_v48 = vsel %vm757_vm1, %v2934_v46, 0.0 }
 0x4bc   : > { %v2938_v49 = vpop.eup %2481 }
 0x4bd   : > { %v1832_v50 = vsel %vm757_vm1, %v2938_v49, 0.0 }
 0x4c4   : > { %1113 = vrot.lane.b32.xlu0 %v2848_v4, %s2564_s30 }
 0x4c8   : > { %1258 = vrot.lane.b32.xlu0 %v2848_v4, %s3298_s12 }
 0x4d7   : > { %1688 = vadd.xlane.f32.xlu1 %v1687_v48 }
 0x4e7   : > { %1833 = vadd.xlane.f32.xlu0 %v1832_v50 }
 0x4e8   : > { %1403 = vrot.lane.b32.xlu1 %v2848_v4, %s3299_s29 }
 0x4ec   : > { %1693 = vrot.lane.b32.xlu1 %v2848_v4, %s3295_s26 }
 0x4f0   : > { %1838 = vrot.lane.b32.xlu1 %v2848_v4, %s3296_s22 }
 0x4f4   : > { %862 = vrot.lane.b32.xlu1 %v861_v51, %s3296_s22 }
 0x4f8   : > { %866 = vrot.lane.b32.xlu1 %v865_v52, %s3295_s26 }
 0x4fc   : > { %874 = vrot.lane.b32.xlu1 %v873_v53, %s3299_s29 }
 0x4fd   : > { %1548 = vrot.lane.b32.xlu0 %v2848_v4, %s2567_s20 }
 0x500   : > { %882 = vrot.lane.b32.xlu1 %v881_v54, %s2564_s30 }
 0x501   : > { %870 = vrot.lane.b32.xlu0 %v869_v55, %s2567_s20 }
 0x505   : > { %878 = vrot.lane.b32.xlu0 %v877_v56, %s3298_s12 }
 0x509   : > { %886 = vrot.lane.b32.xlu0 %v885_v57, %s3297_s11 }
 0x523   : > { %v1109_v58 = vpop.xlane.xlu0 %1108 }
 0x524   : > { %2483 = vrcp.f32 %v1109_v58 }
 0x52b   : > { %v1254_v59 = vpop.xlane.xlu1 %1253 }
 0x52c   : > { %2485 = vrcp.f32 %v1254_v59 }
 0x52e   : > { %v2484_v4 = vpop.eup %2483 }
 0x52f   : > { %v2965_v60 = vmul.f32 %v2484_v4, %v2908_v24  ;;  %v963_v61 = vpop.xlane.xlu1 %962 }
 0x530   : > { %2487 = vrcp.f32 %v963_v61 }
 0x531   : > { %v1164_v62 = vrot.slane %v2965_v60, 2  ;;  %v1160_v63 = vrot.slane %v2965_v60, 1  ;;  %v1172_v2 = vrot.slane %v2965_v60, 4  ;;  %v1168_v3 = vrot.slane %v2965_v60, 3 }
 0x532   : > { %v1180_v8 = vrot.slane %v2965_v60, 6  ;;  %v1176_v9 = vrot.slane %v2965_v60, 5  ;;  %v1184_v16 = vrot.slane %v2965_v60, 7  ;;  %v1112_v21 = vpack.c.bf16 %v2965_v60, %v2965_v60 }
 0x533   : > { %v969_v0 = vpop.permute.xlu1 %968  ;;  %1165 = vrot.lane.b32.xlu1 %v1164_v62, %s3295_s26  ;;  %1161 = vrot.lane.b32.xlu0 %v1160_v63, %s3296_s22  ;;  %v1399_v6 = vpop.xlane.xlu0 %1398 }
 0x534   : > { %2316 = vmatpush3.bf16.msra.mxu1 %v969_v0  ;;  %2489 = vrcp.f32 %v1399_v6 }
 0x535   : > { %2327 = vmatprep.subr.bf16.mxu1 %v2561_v1 }
 0x536   : > { %v2486_v5 = vpop.eup %2485 }
 0x537   : > { %1173 = vrot.lane.b32.xlu1 %v1172_v2, %s3299_s29  ;;  %1169 = vrot.lane.b32.xlu0 %v1168_v3, %s2567_s20  ;;  %v2977_v7 = vmul.f32 %v2486_v5, %v2912_v29 }
 0x539   : > { %v1305_v15 = vrot.slane %v2977_v7, 1  ;;  %v1313_v18 = vrot.slane %v2977_v7, 3  ;;  %v1309_v19 = vrot.slane %v2977_v7, 2  ;;  %v1321_v20 = vrot.slane %v2977_v7, 5 }
 0x53a   : > { %v2488_v10 = vpop.eup %2487  ;;  %v1317_v23 = vrot.slane %v2977_v7, 4  ;;  %v1329_v26 = vrot.slane %v2977_v7, 7  ;;  %v1325_v27 = vrot.slane %v2977_v7, 6  ;;  %v1257_v29 = vpack.c.bf16 %v2977_v7, %v2977_v7 }
 0x53b   : > { %v2982_v11 = vmul.f32 %v2488_v10, %v2916_v33  ;;  %1181 = vrot.lane.b32.xlu1 %v1180_v8, %s2564_s30  ;;  %1177 = vrot.lane.b32.xlu0 %v1176_v9, %s3298_s12  ;;  %v1544_v12 = vpop.xlane.xlu0 %1543 }
 0x53c   : > { %2491 = vrcp.f32 %v1544_v12 }
 0x53d   : > { %v966_v13 = vpack.c.bf16 %v2982_v11, %v2982_v11 }
 0x53e   : > { %v2490_v22 = vpop.eup %2489 }
 0x53f   : > { %2318 = vmatmul.mubr.msk.bf16.vlgmr.msra.gmra.mrb[16].mxu1 %vm757_vm1, %v966_v13  ;;  %1306 = vrot.lane.b32.xlu1 %v1305_v15, %s3296_s22  ;;  %v1114_v17 = vpop.permute.xlu0 %1113  ;;  %v3008_v25 = vmul.f32 %v2490_v22, %v2920_v37 }
 0x540   : > { %1185 = vrot.lane.b32.xlu0 %v1184_v16, %s3297_s11  ;;  %2328 = vmatpush3.bf16.msra.mxu1 %v1114_v17 }
 0x541   : > { %2329 = vmatprep.mubr.msk.bf16.mxu1 %vm2562_vm0, %v2561_v1  ;;  %2339 = vmatprep.subr.bf16.mxu1 %v2561_v1  ;;  %v1454_v28 = vrot.slane %v3008_v25, 2  ;;  %v1450_v30 = vrot.slane %v3008_v25, 1  ;;  %v1462_v31 = vrot.slane %v3008_v25, 4  ;;  %v1458_v33 = vrot.slane %v3008_v25, 3 }
 0x542   : > { %v1470_v36 = vrot.slane %v3008_v25, 6  ;;  %v1466_v37 = vrot.slane %v3008_v25, 5  ;;  %v1474_v40 = vrot.slane %v3008_v25, 7  ;;  %v1402_v50 = vpack.c.bf16 %v3008_v25, %v3008_v25 }
 0x543   : > { %1314 = vrot.lane.b32.xlu1 %v1313_v18, %s2567_s20  ;;  %v1259_v24 = vpop.permute.xlu0 %1258 }
 0x544   : > { %1310 = vrot.lane.b32.xlu0 %v1309_v19, %s3295_s26 }
 0x546   : > { %v2492_v32 = vpop.eup %2491 }
 0x547   : > { %1322 = vrot.lane.b32.xlu1 %v1321_v20, %s3298_s12  ;;  %2330 = vmatmul.mubr.msk.bf16.vlgmr.msra.gmra.mrb[20].mxu1 %vm757_vm1, %v1112_v21  ;;  %v3031_v35 = vmul.f32 %v2492_v32, %v2924_v39  ;;  %v1023_v32 = vrot.slane %v2982_v11, 3 }
 0x548   : > { %1318 = vrot.lane.b32.xlu0 %v1317_v23, %s3299_s29  ;;  %2340 = vmatpush3.bf16.msra.mxu1 %v1259_v24 }
 0x549   : > { %2341 = vmatprep.mubr.msk.bf16.mxu1 %vm2562_vm0, %v2561_v1  ;;  %2351 = vmatprep.subr.bf16.mxu1 %v2561_v1  ;;  %v1595_v38 = vrot.slane %v3031_v35, 1  ;;  %v1603_v41 = vrot.slane %v3031_v35, 3  ;;  %v1599_v39 = vrot.slane %v3031_v35, 2  ;;  %v1611_v42 = vrot.slane %v3031_v35, 5 }
 0x54a   : > { %v1607_v43 = vrot.slane %v3031_v35, 4  ;;  %v1619_v45 = vrot.slane %v3031_v35, 7  ;;  %v1615_v47 = vrot.slane %v3031_v35, 6  ;;  %v1547_v3 = vpack.c.bf16 %v3031_v35, %v3031_v35 }
 0x54b   : > { %1330 = vrot.lane.b32.xlu1 %v1329_v26, %s3297_s11 }
 0x54c   : > { %1326 = vrot.lane.b32.xlu0 %v1325_v27, %s2564_s30 }
 0x54f   : > { %1455 = vrot.lane.b32.xlu1 %v1454_v28, %s3295_s26  ;;  %2342 = vmatmul.mubr.msk.bf16.vlgmr.msra.gmra.mrb[24].mxu1 %vm757_vm1, %v1257_v29  ;;  %v1019_v28 = vrot.slane %v2982_v11, 2  ;;  %v1027_v29 = vrot.slane %v2982_v11, 4 }
 0x550   : > { %1451 = vrot.lane.b32.xlu0 %v1450_v30, %s3296_s22  ;;  %2353 = vmatprep.mubr.msk.bf16.mxu1 %vm2562_vm0, %v2561_v1  ;;  %v1015_v30 = vrot.slane %v2982_v11, 1 }
 0x553   : > { %1463 = vrot.lane.b32.xlu1 %v1462_v31, %s3299_s29  ;;  %v1035_v31 = vrot.slane %v2982_v11, 6 }
 0x554   : > { %1459 = vrot.lane.b32.xlu0 %v1458_v33, %s2567_s20  ;;  %v1031_v33 = vrot.slane %v2982_v11, 5 }
 0x557   : > { %1471 = vrot.lane.b32.xlu1 %v1470_v36, %s2564_s30  ;;  %v1039_v36 = vrot.slane %v2982_v11, 7 }
 0x558   : > { %1467 = vrot.lane.b32.xlu0 %v1466_v37, %s3298_s12 }
 0x55b   : > { %1596 = vrot.lane.b32.xlu1 %v1595_v38, %s3296_s22 }
 0x55c   : > { %1475 = vrot.lane.b32.xlu0 %v1474_v40, %s3297_s11 }
 0x55f   : > { %1604 = vrot.lane.b32.xlu1 %v1603_v41, %s2567_s20 }
 0x560   : > { %1600 = vrot.lane.b32.xlu0 %v1599_v39, %s3295_s26 }
 0x563   : > { %1612 = vrot.lane.b32.xlu1 %v1611_v42, %s3298_s12 }
 0x564   : > { %1608 = vrot.lane.b32.xlu0 %v1607_v43, %s3299_s29  ;;  %v1689_v44 = vpop.xlane.xlu1 %1688 }
 0x565   : > { %2493 = vrcp.f32 %v1689_v44 }
 0x567   : > { %1620 = vrot.lane.b32.xlu1 %v1619_v45, %s3297_s11 }
 0x568   : > { %1616 = vrot.lane.b32.xlu0 %v1615_v47, %s2564_s30  ;;  %v1404_v48 = vpop.permute.xlu1 %1403 }
 0x569   : > { %2352 = vmatpush3.bf16.msra.mxu1 %v1404_v48 }
 0x56a   : > { %2363 = vmatprep.subr.bf16.mxu1 %v2561_v1 }
 0x56c   : > { %v1694_v51 = vpop.permute.xlu1 %1693  ;;  %2354 = vmatmul.mubr.msk.bf16.vlgmr.msra.gmra.mrb[28].mxu1 %vm757_vm1, %v1402_v50 }
 0x56d   : > { %2365 = vmatprep.mubr.msk.bf16.mxu1 %vm2562_vm0, %v2561_v1 }
 0x56f   : > { %v2494_v52 = vpop.eup %2493 }
 0x570   : > { %v3060_v53 = vmul.f32 %v2494_v52, %v2934_v46  ;;  %v1839_v54 = vpop.permute.xlu1 %1838 }
 0x572   : > { %v1740_v55 = vrot.slane %v3060_v53, 1  ;;  %v1744_v56 = vrot.slane %v3060_v53, 2  ;;  %v1748_v59 = vrot.slane %v3060_v53, 3  ;;  %v1752_v4 = vrot.slane %v3060_v53, 4 }
 0x573   : > { %v1756_v0 = vrot.slane %v3060_v53, 5  ;;  %v1760_v2 = vrot.slane %v3060_v53, 6  ;;  %v1764_v8 = vrot.slane %v3060_v53, 7  ;;  %v1692_v20 = vpack.c.bf16 %v3060_v53, %v3060_v53 }
 0x574   : > { %v863_v57 = vpop.permute.xlu1 %862  ;;  %1741 = vrot.lane.b32.xlu0 %v1740_v55, %s3296_s22  ;;  %1745 = vrot.lane.b32.xlu1 %v1744_v56, %s3295_s26  ;;  %v1834_v58 = vpop.xlane.xlu0 %1833 }
 0x575   : > { %2495 = vrcp.f32 %v1834_v58  ;;  %v889_v46 = vsel %vm757_vm1, %v2862_v14, %v863_v57 }
 0x578   : > { %v867_v61 = vpop.permute.xlu1 %866  ;;  %1749 = vrot.lane.b32.xlu0 %v1748_v59, %s2567_s20  ;;  %1753 = vrot.lane.b32.xlu1 %v1752_v4, %s3299_s29  ;;  %v1549_v62 = vpop.permute.xlu0 %1548 }
 0x579   : > { %v891_v63 = vsel %vm890_vm2, %v889_v46, %v867_v61  ;;  %2364 = vmatpush3.bf16.msra.mxu1 %v1549_v62 }
 0x57a   : > { %2375 = vmatprep.subr.bf16.mxu1 %v2561_v1 }
 0x57c   : > { %v875_v14 = vpop.permute.xlu1 %874  ;;  %1757 = vrot.lane.b32.xlu0 %v1756_v0, %s3298_s12  ;;  %1761 = vrot.lane.b32.xlu1 %v1760_v2, %s2564_s30  ;;  %v871_v5 = vpop.permute.xlu0 %870 }
 0x57d   : > { %2366 = vmatmul.mubr.msk.bf16.vlgmr.msra.gmra.mrb[32].mxu1 %vm757_vm1, %v1547_v3  ;;  %v893_v6 = vsel %vm892_vm3, %v891_v63, %v871_v5 }
 0x57e   : > { %2376 = vmatpush3.bf16.msra.mxu1 %v1694_v51  ;;  %v895_v9 = vsel %vm894_vm4, %v893_v6, %v875_v14  ;;  %2377 = vmatprep.mubr.msk.bf16.mxu1 %vm2562_vm0, %v2561_v1 }
 0x57f   : > { %v2496_v10 = vpop.eup %2495  ;;  %2387 = vmatprep.subr.bf16.mxu1 %v2561_v1 }
 0x580   : > { %v3088_v12 = vmul.f32 %v2496_v10, %v2938_v49  ;;  %v883_v13 = vpop.permute.xlu1 %882  ;;  %1765 = vrot.lane.b32.xlu0 %v1764_v8, %s3297_s11  ;;  %v879_v15 = vpop.permute.xlu0 %878 }
 0x581   : > { %v897_v16 = vsel %vm896_vm5, %v895_v9, %v879_v15 }
 0x582   : > { %v1889_v17 = vrot.slane %v3088_v12, 2  ;;  %v1885_v18 = vrot.slane %v3088_v12, 1  ;;  %v899_v19 = vsel %vm898_vm6, %v897_v16, %v883_v13  ;;  %v1897_v22 = vrot.slane %v3088_v12, 4 }
 0x583   : > { %v1893_v23 = vrot.slane %v3088_v12, 3  ;;  %v1905_v24 = vrot.slane %v3088_v12, 6  ;;  %v1901_v26 = vrot.slane %v3088_v12, 5  ;;  %v1837_v27 = vpack.c.bf16 %v3088_v12, %v3088_v12 }
 0x584   : > { %1890 = vrot.lane.b32.xlu0 %v1889_v17, %s3295_s26  ;;  %1886 = vrot.lane.b32.xlu1 %v1885_v18, %s3296_s22  ;;  %v887_v49 = vpop.permute.xlu0 %886 }
 0x585   : > { %2378 = vmatmul.mubr.msk.bf16.vlgmr.msra.gmra.mrb[36].mxu1 %vm757_vm1, %v1692_v20  ;;  %v3101_v21 = vsel %vm900_vm7, %v899_v19, %v887_v49 }
 0x586   : > { %2388 = vmatpush3.bf16.msra.mxu1 %v1839_v54  ;;  %2389 = vmatprep.mubr.msk.bf16.mxu1 %vm2562_vm0, %v2561_v1  ;;  %v1909_v1 = vrot.slane %v3088_v12, 7 }
 0x588   : > { %1898 = vrot.lane.b32.xlu0 %v1897_v22, %s3299_s29  ;;  %1894 = vrot.lane.b32.xlu1 %v1893_v23, %s2567_s20 }
 0x58c   : > { %1906 = vrot.lane.b32.xlu0 %v1905_v24, %s2564_s30  ;;  %1902 = vrot.lane.b32.xlu1 %v1901_v26, %s3298_s12 }
 0x58d   : > { %2390 = vmatmul.mubr.msk.bf16.vlgmr.msra.gmra.mrb[40].mxu1 %vm757_vm1, %v1837_v27 }
 0x590   : > { %1020 = vrot.lane.b32.xlu0 %v1019_v28, %s3295_s26  ;;  %1910 = vrot.lane.b32.xlu1 %v1909_v1, %s3297_s11 }
 0x594   : > { %1028 = vrot.lane.b32.xlu0 %v1027_v29, %s3299_s29  ;;  %1016 = vrot.lane.b32.xlu1 %v1015_v30, %s3296_s22 }
 0x598   : > { %1036 = vrot.lane.b32.xlu0 %v1035_v31, %s2564_s30  ;;  %1024 = vrot.lane.b32.xlu1 %v1023_v32, %s2567_s20 }
 0x59c   : > { %1032 = vrot.lane.b32.xlu1 %v1031_v33, %s3298_s12 }
 0x5a0   : > { %1040 = vrot.lane.b32.xlu1 %v1039_v36, %s3297_s11 }
 0x5a5   : > { %v1166_v37 = vpop.permute.xlu1 %1165  ;;  %v1162_v38 = vpop.permute.xlu0 %1161 }
 0x5a6   : > { %v1188_v40 = vsel %vm757_vm1, %v2965_v60, %v1162_v38 }
 0x5a7   : > { %v1189_v41 = vsel %vm890_vm2, %v1188_v40, %v1166_v37 }
 0x5a9   : > { %v1174_v39 = vpop.permute.xlu1 %1173  ;;  %v1170_v42 = vpop.permute.xlu0 %1169 }
 0x5aa   : > { %v1190_v43 = vsel %vm892_vm3, %v1189_v41, %v1170_v42 }
 0x5ab   : > { %v1191_v44 = vsel %vm894_vm4, %v1190_v43, %v1174_v39 }
 0x5ad   : > { %v1182_v45 = vpop.permute.xlu1 %1181  ;;  %v1178_v47 = vpop.permute.xlu0 %1177 }
 0x5ae   : > { %v1192_v48 = vsel %vm896_vm5, %v1191_v44, %v1178_v47 }
 0x5af   : > { %v1193_v50 = vsel %vm898_vm6, %v1192_v48, %v1182_v45 }
 0x5b1   : > { %v1307_v51 = vpop.permute.xlu1 %1306 }
 0x5b2   : > { %v1186_v52 = vpop.permute.xlu0 %1185  ;;  %v1333_v55 = vsel %vm757_vm1, %v2977_v7, %v1307_v51 }
 0x5b3   : > { %v3140_v54 = vsel %vm900_vm7, %v1193_v50, %v1186_v52 }
 0x5b5   : > { %v1315_v60 = vpop.permute.xlu1 %1314 }
 0x5b6   : > { %v1311_v56 = vpop.permute.xlu0 %1310 }
 0x5b7   : > { %v1334_v57 = vsel %vm890_vm2, %v1333_v55, %v1311_v56 }
 0x5b8   : > { %v1335_v58 = vsel %vm892_vm3, %v1334_v57, %v1315_v60 }
 0x5b9   : > { %v1323_v59 = vpop.permute.xlu1 %1322 }
 0x5ba   : > { %v1319_v4 = vpop.permute.xlu0 %1318 }
 0x5bb   : > { %v1336_v46 = vsel %vm894_vm4, %v1335_v58, %v1319_v4 }
 0x5bc   : > { %v1337_v61 = vsel %vm896_vm5, %v1336_v46, %v1323_v59 }
 0x5bd   : > { %v1331_v62 = vpop.permute.xlu1 %1330 }
 0x5be   : > { %v1327_v63 = vpop.permute.xlu0 %1326 }
 0x5bf   : > { %v1338_v0 = vsel %vm898_vm6, %v1337_v61, %v1327_v63 }
 0x5c0   : > { %v3150_v2 = vsel %vm900_vm7, %v1338_v0, %v1331_v62 }
 0x5c1   : > { %v1456_v3 = vpop.permute.xlu1 %1455 }
 0x5c2   : > { %v1452_v7 = vpop.permute.xlu0 %1451 }
 0x5c3   : > { %v1478_v14 = vsel %vm757_vm1, %v3008_v25, %v1452_v7 }
 0x5c4   : > { %v1479_v6 = vsel %vm890_vm2, %v1478_v14, %v1456_v3 }
 0x5c5   : > { %v1464_v5 = vpop.permute.xlu1 %1463 }
 0x5c6   : > { %v1460_v8 = vpop.permute.xlu0 %1459 }
 0x5c7   : > { %v1480_v9 = vsel %vm892_vm3, %v1479_v6, %v1460_v8 }
 0x5c8   : > { %v1481_v10 = vsel %vm894_vm4, %v1480_v9, %v1464_v5 }
 0x5c9   : > { %v1472_v13 = vpop.permute.xlu1 %1471 }
 0x5ca   : > { %v1468_v15 = vpop.permute.xlu0 %1467 }
 0x5cb   : > { %v1482_v58 = vsel %vm896_vm5, %v1481_v10, %v1468_v15 }
 0x5cc   : > { %v1483_v14 = vsel %vm898_vm6, %v1482_v58, %v1472_v13 }
 0x5cd   : > { %v1597_v16 = vpop.permute.xlu1 %1596 }
 0x5ce   : > { %v1476_v17 = vpop.permute.xlu0 %1475  ;;  %v1623_v42 = vsel %vm757_vm1, %v3031_v35, %v1597_v16  ;;  %v1960_v16 = vrot.slane %v3140_v54, 6 }
 0x5cf   : > { %v1484_v9 = vsel %vm900_vm7, %v1483_v14, %v1476_v17 }
 0x5d1   : > { %v1605_v18 = vpop.permute.xlu1 %1604 }
 0x5d2   : > { %v1601_v19 = vpop.permute.xlu0 %1600 }
 0x5d3   : > { %v1624_v43 = vsel %vm890_vm2, %v1623_v42, %v1601_v19 }
 0x5d4   : > { %v1625_v52 = vsel %vm892_vm3, %v1624_v43, %v1605_v18 }
 0x5d5   : > { %v1613_v20 = vpop.permute.xlu1 %1612 }
 0x5d6   : > { %v1609_v49 = vpop.permute.xlu0 %1608 }
 0x5d7   : > { %v1626_v35 = vsel %vm894_vm4, %v1625_v52, %v1609_v49 }
 0x5d8   : > { %v1627_v59 = vsel %vm896_vm5, %v1626_v35, %v1613_v20  ;;  %v1963_v20 = vrot.slane %v3150_v2, 5 }
 0x5d9   : > { %v1621_v22 = vpop.permute.xlu1 %1620 }
 0x5da   : > { %v1617_v23 = vpop.permute.xlu0 %1616 }
 0x5db   : > { %v1628_v61 = vsel %vm898_vm6, %v1627_v59, %v1617_v23 }
 0x5dc   : > { %v1629_v18 = vsel %vm900_vm7, %v1628_v61, %v1621_v22 }
 0x5dd   : > { %v1969_v22 = vrot.slane %v1629_v18, 3 }
 0x5e6   : > { %v1746_v24 = vpop.permute.xlu1 %1745  ;;  %v1742_v25 = vpop.permute.xlu0 %1741 }
 0x5e7   : > { %v1768_v44 = vsel %vm757_vm1, %v3060_v53, %v1742_v25 }
 0x5ea   : > { %v1750_v26 = vpop.permute.xlu0 %1749  ;;  %v1754_v27 = vpop.permute.xlu1 %1753 }
 0x5ee   : > { %v1758_v28 = vpop.permute.xlu0 %1757  ;;  %v1762_v1 = vpop.permute.xlu1 %1761 }
 0x5f2   : > { %v1766_v29 = vpop.permute.xlu0 %1765 }
 0x5f6   : > { %v1887_v30 = vpop.permute.xlu1 %1886  ;;  %v1891_v31 = vpop.permute.xlu0 %1890 }
 0x5f7   : > { %v1913_v48 = vsel %vm757_vm1, %v3088_v12, %v1887_v30 }
 0x5f8   : > { %v1914_v55 = vsel %vm890_vm2, %v1913_v48, %v1891_v31 }
 0x5fa   : > { %v1895_v32 = vpop.permute.xlu1 %1894  ;;  %v1899_v33 = vpop.permute.xlu0 %1898 }
 0x5fb   : > { %v1915_v57 = vsel %vm892_vm3, %v1914_v55, %v1895_v32 }
 0x5fc   : > { %v1916_v63 = vsel %vm894_vm4, %v1915_v57, %v1899_v33 }
 0x5fe   : > { %v1903_v36 = vpop.permute.xlu1 %1902  ;;  %v1907_v37 = vpop.permute.xlu0 %1906 }
 0x5ff   : > { %v1917_v5 = vsel %vm896_vm5, %v1916_v63, %v1903_v36 }
 0x600   : > { %v1918_v23 = vsel %vm898_vm6, %v1917_v5, %v1907_v37 }
 0x602   : > { %v1911_v38 = vpop.permute.xlu1 %1910  ;;  %v1021_v40 = vpop.permute.xlu0 %1020 }
 0x603   : > { %v1919_v25 = vsel %vm900_vm7, %v1918_v23, %v1911_v38 }
 0x606   : > { %v1017_v41 = vpop.permute.xlu1 %1016  ;;  %v1029_v50 = vpop.permute.xlu0 %1028 }
 0x607   : > { %v1043_v39 = vsel %vm757_vm1, %v2982_v11, %v1017_v41  ;;  %v1769_v11 = vsel %vm890_vm2, %v1768_v44, %v1746_v24  ;;  %v1966_v24 = vrot.slane %v1484_v9, 4 }
 0x608   : > { %v1044_v47 = vsel %vm890_vm2, %v1043_v39, %v1021_v40  ;;  %v1770_v60 = vsel %vm892_vm3, %v1769_v11, %v1750_v26 }
 0x609   : > { %v1771_v4 = vsel %vm894_vm4, %v1770_v60, %v1754_v27 }
 0x60a   : > { %v1025_v45 = vpop.permute.xlu1 %1024  ;;  %v1037_v46 = vpop.permute.xlu0 %1036  ;;  %v1772_v62 = vsel %vm896_vm5, %v1771_v4, %v1758_v28  ;;  %v1975_v28 = vrot.slane %v1919_v25, 1 }
 0x60b   : > { %v1045_v51 = vsel %vm892_vm3, %v1044_v47, %v1025_v45  ;;  %v1773_v13 = vsel %vm898_vm6, %v1772_v62, %v1762_v1 }
 0x60c   : > { %v1046_v56 = vsel %vm894_vm4, %v1045_v51, %v1029_v50  ;;  %v1774_v49 = vsel %vm900_vm7, %v1773_v13, %v1766_v29 }
 0x60d   : > { %v1972_v27 = vrot.slane %v1774_v49, 2 }
 0x60e   : > { %v1033_v53 = vpop.permute.xlu1 %1032 }
 0x60f   : > { %v1047_v12 = vsel %vm896_vm5, %v1046_v56, %v1033_v53 }
 0x610   : > { %v1048_v7 = vsel %vm898_vm6, %v1047_v12, %v1037_v46 }
 0x612   : > { %v1008_v0 = vpop.f32.mrb[16].mxu1  ;;  %v1041_v3 = vpop.permute.xlu1 %1040 }
 0x613   : > { %v1049_v6 = vsel %vm900_vm7, %v1048_v7, %v1041_v3  ;;  %v2319_v8 = vpop.f32.mrb[17].mxu1  ;;  %1921 = vrot.lane.b32.xlu0 %v1008_v0, %s3296_s22 }
 0x614   : > { %v1957_v10 = vrot.slane %v1049_v6, 7  ;;  %v1011_v15 = vpop.f32.mrb[18].mxu1 }
 0x615   : > { %v2320_v19 = vpop.f32.mrb[19].mxu1 }
 0x616   : > { %v1978_v17 = vsel %vm1977_vm8, %v3101_v21, %v1957_v10 }
 0x617   : > { %v1980_v54 = vsel %vm1979_vm9, %v1978_v17, %v1960_v16 }
 0x618   : > { %v1982_v26 = vsel %vm1981_vm10, %v1980_v54, %v1963_v20 }
 0x619   : > { %v1984_v2 = vsel %vm1983_vm11, %v1982_v26, %v1966_v24 }
 0x61a   : > { %v1986_v21 = vsel %vm1985_vm12, %v1984_v2, %v1969_v22  ;;  %v1153_v1 = vpop.f32.mrb[20].mxu1 }
 0x61b   : > { %v1988_v29 = vsel %vm1987_vm13, %v1986_v21, %v1972_v27  ;;  %v2331_v30 = vpop.f32.mrb[21].mxu1  ;;  %1925 = vrot.lane.b32.xlu1 %v1153_v1, %s3295_s26 }
 0x61c   : > { %v1990_v31 = vsel %vm1989_vm14, %v1988_v29, %v1975_v28  ;;  %v1156_v32 = vpop.f32.mrb[22].mxu1 }
 0x61d   : > { %1991 = vst [vmem:[%s409_s19] sm:$0xff] %v1990_v31  ;;  %v2332_v33 = vpop.f32.mrb[23].mxu1 }
 0x622   : > { %v1298_v36 = vpop.f32.mrb[24].mxu1 }
 0x623   : > { %v2343_v37 = vpop.f32.mrb[25].mxu1  ;;  %1929 = vrot.lane.b32.xlu0 %v1298_v36, %s2567_s20  ;;  %s2124_s20 = sshll.u32 %s381_s25, 3 }
 0x624   : > { %v1301_v38 = vpop.f32.mrb[26].mxu1  ;;  %s383_s21 = scalar_lea.vmem [#allocation2], %s2124_s20 }
 0x625   : > { %v2344_v40 = vpop.f32.mrb[27].mxu1  ;;  %s2010_s28 = sshll.u32 %s383_s21, 4  ;;  %s3224_s28 = int_to_ptr.vmem [resolvable:$true] %s2010_s28 }
 0x63f   : > { %v1443_v41 = vpop.f32.mrb[28].mxu1 }
 0x640   : > { %v2355_v39 = vpop.f32.mrb[29].mxu1  ;;  %1933 = vrot.lane.b32.xlu1 %v1443_v41, %s3299_s29  ;;  %s2570_s29 = smov [#allocation2]  }
 0x641   : > { %v1446_v42 = vpop.f32.mrb[30].mxu1  ;;  %s2501_s15 = sshll.u32 %s2570_s29, 4  ;;  %s2502_s15 = int_to_ptr.vmem [resolvable:$false] %s2501_s15 }
 0x642   : > { %v2356_v43 = vpop.f32.mrb[31].mxu1  ;;  %s2503_s27 = scalar_lea.vmem %s2502_s15, 256  ;;  %p2504_p1 = scmp.lt.s32.totalorder %s3224_s28, %s2502_s15 }
 0x650   : > { %v1588_v44 = vpop.f32.mrb[32].mxu1 }
 0x651   : > { %1937 = vrot.lane.b32.xlu0 %v1588_v44, %s3298_s12  ;;  %v2367_v45 = vpop.f32.mrb[33].mxu1  ;;  %s2497_s12 = scalar_lea.vmem %s3224_s28, 128 }
 0x652   : > { %v1591_v47 = vpop.f32.mrb[34].mxu1  ;;  %p2498_p12 = scmp.ne.s32.totalorder %s3224_s28, %s2497_s12  ;;  %p2505_p2 = scmp.lt.s32.totalorder %s2503_s27, %s2497_s12 }
 0x653   : > { %v2368_v48 = vpop.f32.mrb[35].mxu1 }
 0x654   : > { %p2499_p13 = pnand %p2498_p12, %p2664_p5  ;;  %p2506_p3 = por %p2505_p2, %p2504_p1 }
 0x656   : > { %p2500_p0 = pneg %p2499_p13 }
 0x658   : > { %v1733_v50 = vpop.f32.mrb[36].mxu1  ;;  %p2507_p4 = pnand %p2506_p3, %p2500_p0 }
 0x659   : > { %1941 = vrot.lane.b32.xlu1 %v1733_v50, %s2564_s30  ;;  %v2379_v51 = vpop.f32.mrb[37].mxu1  ;;  %s2175_s30 = sshll.u32 %s2647_s17, 7  ;;  %s1993_s17 = scalar_lea.sflag [#allocation3], %s381_s25 }
 0x65a   : > { %v1736_v52 = vpop.f32.mrb[38].mxu1 }
 0x65b   : > { %v2380_v11 = vpop.f32.mrb[39].mxu1 }
 0x660   : > { %v1878_v35 = vpop.f32.mrb[40].mxu1 }
 0x661   : > { %1945 = vrot.lane.b32.xlu0 %v1878_v35, %s3297_s11  ;;  %v2391_v60 = vpop.f32.mrb[41].mxu1  ;;  %s3222_s11 = scalar_lea.hbm %s3274_s9, %s2175_s30 }
 0x662   : > { %v1881_v55 = vpop.f32.mrb[42].mxu1 }
 0x663   : > { %v2392_v53 = vpop.f32.mrb[43].mxu1 }
 0x685   : > { %v1922_v56 = vpop.permute.xlu0 %1921 }
 0x686   : > { %v1948_v59 = vsel %vm757_vm1, %v2899_v34, %v1922_v56 }
 0x68d   : > { %v1926_v57 = vpop.permute.xlu1 %1925 }
 0x68e   : > { %v1949_v4 = vsel %vm890_vm2, %v1948_v59, %v1926_v57 }
 0x695   : > { %v1930_v12 = vpop.permute.xlu0 %1929 }
 0x696   : > { %v1950_v61 = vsel %vm892_vm3, %v1949_v4, %v1930_v12 }
 0x6b2   : > { %v1934_v58 = vpop.permute.xlu1 %1933 }
 0x6b3   : > { %v1951_v63 = vsel %vm894_vm4, %v1950_v61, %v1934_v58 }
 0x6c3   : > { %v1938_v46 = vpop.permute.xlu0 %1937 }
 0x6c4   : > { %v1952_v0 = vsel %vm896_vm5, %v1951_v63, %v1938_v46 }
 0x6cb   : > { %v1942_v62 = vpop.permute.xlu1 %1941 }
 0x6cc   : > { %v1953_v3 = vsel %vm898_vm6, %v1952_v0, %v1942_v62 }
 0x6d3   : > { %v1946_v7 = vpop.permute.xlu0 %1945 }
 0x6d4   : > { %v1954_v34 = vsel %vm900_vm7, %v1953_v3, %v1946_v7 }
 0x6d5   : > { %1955 = vst [vmem:[%s383_s21] sm:$0xff] %v1954_v34 }
 0x6d6   : > { %2510 = shalt.err (!%p2507_p4)
}
 0x6d7   : > { %s2511_s18 = scalar_lea.hbm %s3222_s11, 128  ;;  %s2515_s20 = scalar_lea.hbm %s3274_s9, 256 }
 0x6d8   : > { %p2512_p7 = scmp.ne.s32.totalorder %s3222_s11, %s2511_s18  ;;  %p2516_p10 = scmp.lt.u32.totalorder %s3222_s11, %s3274_s9 }
 0x6d9   : > { %p2517_p11 = scmp.lt.u32.totalorder %s2515_s20, %s2511_s18  ;;  %p2519_p13 = scmp.lt.u32.totalorder %s2511_s18, %s3222_s11 }
 0x6da   : > { %p2513_p8 = pnand %p2512_p7, %p2664_p5 }
 0x6db   : > { %p2518_p12 = por %p2517_p11, %p2516_p10 }
 0x6dc   : > { %p2514_p9 = pneg %p2513_p8 }
 0x6dd   : > { %p2520_p0 = por %p2519_p13, %p2518_p12 }
 0x6df   : > { %p2521_p1 = pnand %p2520_p0, %p2514_p9 }
 0x6e1   : > { %2524 = shalt.err (!%p2521_p1)
}
 0x6e2   : > { %2393 = dma.vmem_to_hbm [thread:$0]  (%p2664_p5), %s3224_s28, 128, %s3222_s11, %s1993_s17  }
 0x6e3 PF: > { %p2399_p2 = scmp.ge.s32.totalorder %s2559_s16, 2  ;;  %s2025_s26 = sand.u32 1, %s2547_s13  }
 0x6e4   : > { %s2026_s22 = scalar_lea.sflag [#allocation3], %s2025_s26 }
 0x6e5   : > { %p2396_p3 = pnand %p2399_p2, %p2668_p6 }
 0x6e7   : > { %2542 = dma.done.wait (!%p2396_p3), %s2026_s22, 128  }
 0x6e8   : > { %2544 = vsyncadd (!%p2396_p3), %s2026_s22, 4294967168  ;;  %s3301_s16 = sld [smem:[#allocation6_spill]]  ;;  %s3302_s12 = sld [smem:[#allocation5_spill]] }
 0x6e9   : > { %s3303_s15 = sld [smem:[#allocation7_spill]]  ;;  %s3304_s13 = smov %s2551_s14 }
 0x6ee   : > { %p21_p4 = scmp.ge.s32.totalorder %s3301_s16, 4   ;;  %s3305_s14 = smov %s3302_s12 }
 0x6f0   :  { %23 = sbr.rel (!%p21_p4) target bundleno = 3 (0x3), region = 109 }
 0x6f7   :  { %2038 = vsyncpa [#allocation3], 1 }
 0x6f8   :  { %2040 = vsyncpa [#allocation3 + $0x1], 1 }

</bundles_post_ra>
